<compile_context>
chip_gen: v7x
topology: tpu7x:2x2x1
jax: 0.10.0
libtpu: 0.0.40
codegen_flags: <defaults>
</compile_context>

<pallas_src>
import jax
import jax.numpy as jnp
from jax.experimental import pallas as pl
from jax.experimental.pallas import tpu as pltpu

LANE = 128
SUB = 8


def _round_up(v, m):
    return (v + m - 1) // m * m


def _cdiv(a, b):
    return -(-a // b)


def _est_vmem_bytes(nb, ht, wp, wo, cin, cop, cout):
    """Rough physical (lane-padded) per-step VMEM working set, in bytes."""
    hpt = ht + 2
    cin_p = _round_up(cin, LANE)
    k = 9 * cin
    k_p = _round_up(k, LANE)
    m = nb * ht * wo
    x_blk = nb * hpt * wp * cin_p * 2            # bf16 input block (lane padded)
    out_blk = nb * ht * wo * _round_up(cout, LANE) * 2   # bf16 output block tile
    w_blk = _round_up(k, SUB) * cop * 2
    bn_blk = SUB * cop * 4
    patch = m * k_p * 2 * 2                      # bf16 patch + concat temporaries
    acc = m * cop * 4 * 2                        # f32 acc + epilogue temporary
    # inputs/outputs are double-buffered by the pipeline
    return 2 * (x_blk + out_blk) + w_blk + bn_blk + patch + acc


def _conv_bn_relu_kernel(x_ref, w_ref, bn_ref, o_ref):
    """Fused 3x3 conv + folded BatchNorm (eval) + ReLU for one (Nb, Ht) tile.

    x_ref : (1, 1, Nb, Ht+2, Wp, Cin)  zero-padded NHWC window, bf16
    w_ref : (9*Cin, Cop)               im2col-reshaped weights, bf16 (Cop%128==0)
    bn_ref: (2, Cop)                   row 0 = folded scale, row 1 = folded shift (f32)
    o_ref : (1, 1, Nb, Ht, Wo, Cout)   output tile, bf16, only valid channels
    """
    _, _, Nb, Hpt, Wp, Cin = x_ref.shape
    _, _, _, Ht, Wo, Cout = o_ref.shape

    # Load the whole window once; stay in bf16 end-to-end (MXU operand dtype).
    x = x_ref[0, 0]                                        # (Nb, Hpt, Wp, Cin) bf16

    # Width (dw) taps: each shifted view is materialized exactly once and
    # reused for all three dh taps.
    taps_w = [x[:, :, dw:dw + Wo, :] for dw in range(3)]
    xw = jnp.concatenate(taps_w, axis=-1)                  # (Nb, Hpt, Wo, 3*Cin)

    # Height (dh) taps are slices along an untiled leading dim -> cheap.
    patch = jnp.concatenate(
        [xw[:, dh:dh + Ht] for dh in range(3)], axis=-1)   # (Nb, Ht, Wo, 9*Cin)

    # One im2col matmul on the MXU: M = Nb*Ht*Wo, K = 9*Cin, bf16 x bf16 -> f32.
    patch = patch.reshape(Nb * Ht * Wo, 9 * Cin)
    acc = jnp.dot(patch, w_ref[...],
                  preferred_element_type=jnp.float32)      # (M, Cop) f32

    # Fused BatchNorm (affine, eval mode) + ReLU epilogue in f32.
    y = acc * bn_ref[0:1, :] + bn_ref[1:2, :]
    y = jnp.maximum(y, 0.0)

    # Drop the channel padding before writeback; store bf16 (halves HBM bytes,
    # and avoids the ~16x padded-channel writeback).
    y = y[:, :Cout]                                        # (M, Cout)
    o_ref[...] = y.reshape(1, 1, Nb, Ht, Wo, Cout).astype(o_ref.dtype)


def conv_bn_relu(x_nchw, weight, bias, gamma, beta, running_mean, running_var,
                 eps=1e-5):
    """Forward pass of the PyTorch `conv` module (eval-mode BatchNorm).

    x_nchw : (N, Cin, H, W) float32
    weight : (Cout, Cin, 3, 3) float32 (PyTorch OIHW convention)
    Returns (N, Cout, H, W) float32.
    """
    N, Cin, H, W = x_nchw.shape
    Cout = weight.shape[0]

    Cop = _round_up(Cout, LANE)           # matmul N dim (minimal multiple of 128)
    Wo = _round_up(W, SUB)                # output width padded to sublane multiple
    Wp = _round_up(Wo + 2, SUB)           # padded input width (halo + alignment)

    # ---- tile selection: Ht (rows / step) and Nb (batch elems / step). ----
    budget = 24 * 1024 * 1024             # per-step working-set target
    nt = max(1, _cdiv(H, 64))
    Ht = _cdiv(H, nt)
    while Ht > SUB and _est_vmem_bytes(1, Ht, Wp, Wo, Cin, Cop, Cout) > budget:
        nt *= 2
        Ht = _cdiv(H, nt)
    nt = _cdiv(H, Ht)
    H_pad = nt * Ht

    Nb = 1
    for cand in range(N, 0, -1):
        if N % cand:
            continue
        if (cand * Ht * Wo <= 1024 and
                _est_vmem_bytes(cand, Ht, Wp, Wo, Cin, Cop, Cout) <= budget):
            Nb = cand
            break
    NB = N // Nb

    # --- interface glue (outside the kernel): NCHW -> NHWC, pad, bf16 cast. ---
    # TODO(synk): in a full network keep activations NHWC end-to-end so these
    #             transposes/pads are not repaid on every layer.
    x_nhwc = jnp.transpose(x_nchw, (0, 2, 3, 1)).astype(jnp.bfloat16)
    x_pad = jnp.pad(x_nhwc, ((0, 0), (1, H_pad + 1 - H), (1, Wp - W - 1), (0, 0)))

    # Overlapping H-tile windows (2-row halo) gathered once in the wrapper so
    # the kernel side is plain BlockSpec pipelining.
    x_tiles = jnp.stack([x_pad[:, t * Ht: t * Ht + Ht + 2] for t in range(nt)],
                        axis=1)                            # (N, nt, Ht+2, Wp, Cin)
    x_tiles = x_tiles.reshape(NB, Nb, nt, Ht + 2, Wp, Cin)
    x_tiles = jnp.transpose(x_tiles, (0, 2, 1, 3, 4, 5))   # (NB, nt, Nb, Ht+2, Wp, Cin)

    # OIHW -> HWIO -> im2col layout (9*Cin, Cop), Cout zero-padded to 128 lanes.
    w_hwio = jnp.transpose(weight, (2, 3, 1, 0))
    w_hwio = jnp.pad(w_hwio, ((0, 0), (0, 0), (0, 0), (0, Cop - Cout)))
    w_mat = w_hwio.reshape(9 * Cin, Cop).astype(jnp.bfloat16)

    # Fold conv bias + eval-mode BN into one per-channel scale/shift pair (f32).
    scale = gamma / jnp.sqrt(running_var + eps)
    shift = (bias - running_mean) * scale + beta
    bn = jnp.stack([scale, shift]).astype(jnp.float32)      # (2, Cout)
    bn = jnp.pad(bn, ((0, 0), (0, Cop - Cout)))

    est = _est_vmem_bytes(Nb, Ht, Wp, Wo, Cin, Cop, Cout)
    vmem_limit = int(min(max(2 * est, 8 * 1024 * 1024), 48 * 1024 * 1024))

    out_elems = NB * nt * Nb * Ht * Wo * Cout
    flops = 2 * N * H_pad * Wo * (9 * Cin) * Cop
    bytes_accessed = (x_tiles.size * 2 + w_mat.size * 2 + bn.size * 4
                      + out_elems * 2)
    cost = pl.CostEstimate(flops=flops, transcendentals=0,
                           bytes_accessed=bytes_accessed)

    out_tiles = pl.pallas_call(
        _conv_bn_relu_kernel,
        out_shape=jax.ShapeDtypeStruct((NB, nt, Nb, Ht, Wo, Cout), jnp.bfloat16),
        grid_spec=pltpu.PrefetchScalarGridSpec(
            num_scalar_prefetch=0,
            grid=(NB, nt),
            in_specs=[
                pl.BlockSpec((1, 1, Nb, Ht + 2, Wp, Cin),
                             lambda i, t: (i, t, 0, 0, 0, 0)),
                pl.BlockSpec((9 * Cin, Cop), lambda i, t: (0, 0)),
                pl.BlockSpec((2, Cop), lambda i, t: (0, 0)),
            ],
            out_specs=pl.BlockSpec((1, 1, Nb, Ht, Wo, Cout),
                                   lambda i, t: (i, t, 0, 0, 0, 0)),
        ),
        compiler_params=pltpu.CompilerParams(
            dimension_semantics=("parallel", "parallel"),
            vmem_limit_bytes=vmem_limit),
        cost_estimate=cost,
    )(x_tiles, w_mat, bn)

    # Reassemble: (NB, nt, Nb, Ht, Wo, Cout) -> (N, H, W, Cout) -> NCHW f32.
    out = jnp.transpose(out_tiles, (0, 2, 1, 3, 4, 5)).reshape(N, H_pad, Wo, Cout)
    out = out[:, :H, :W, :].astype(jnp.float32)
    return jnp.transpose(out, (0, 3, 1, 2))


def _reference(x_nchw, weight, bias, gamma, beta, running_mean, running_var,
               eps=1e-5):
    """Pure-JAX reference. Conv operands are quantized to bf16 (matching the
    kernel's MXU operand dtype); accumulation / BN math stays in f32."""
    xq = x_nchw.astype(jnp.bfloat16).astype(jnp.float32)
    wq = weight.astype(jnp.bfloat16).astype(jnp.float32)
    y = jax.lax.conv_general_dilated(
        xq, wq, window_strides=(1, 1), padding="SAME",
        dimension_numbers=("NCHW", "OIHW", "NCHW"),
        precision=jax.lax.Precision.HIGHEST)
    y = y + bias.reshape(1, -1, 1, 1)
    y = (y - running_mean.reshape(1, -1, 1, 1)) / jnp.sqrt(
        running_var.reshape(1, -1, 1, 1) + eps)
    y = y * gamma.reshape(1, -1, 1, 1) + beta.reshape(1, -1, 1, 1)
    return jnp.maximum(y, 0.0)


if __name__ == "__main__":
    key = jax.random.PRNGKey(0)
    k_x, k_w, k_b, k_g, k_beta, k_mean, k_var = jax.random.split(key, 7)

    N, Cin, H, W = 2, 4, 16, 16
    Cout = 8

    x = jax.random.normal(k_x, (N, Cin, H, W), dtype=jnp.float32)

    # Deterministic synthetic parameters (shapes per nn.Conv2d / nn.BatchNorm2d).
    weight = 0.1 * jax.random.normal(k_w, (Cout, Cin, 3, 3), dtype=jnp.float32)
    bias = 0.1 * jax.random.normal(k_b, (Cout,), dtype=jnp.float32)
    gamma = 1.0 + 0.1 * jax.random.normal(k_g, (Cout,), dtype=jnp.float32)
    beta = 0.1 * jax.random.normal(k_beta, (Cout,), dtype=jnp.float32)
    running_mean = 0.1 * jax.random.normal(k_mean, (Cout,), dtype=jnp.float32)
    running_var = jnp.abs(
        1.0 + 0.1 * jax.random.normal(k_var, (Cout,), dtype=jnp.float32))

    fwd = jax.jit(conv_bn_relu)
    out = jax.block_until_ready(
        fwd(x, weight, bias, gamma, beta, running_mean, running_var))

    ref = _reference(x, weight, bias, gamma, beta, running_mean, running_var)
    assert out.shape == (N, Cout, H, W), out.shape
    # Kernel stores bf16 activations (epilogue in f32); allow bf16 output rounding.
    max_err = float(jnp.max(jnp.abs(out - ref)))
    assert max_err < 2e-2, max_err

    print("KERNEL_OK")
</pallas_src>

<mosaic_0001>
module attributes {stable_mosaic.version = 11 : i64} {
  func.func @_conv_bn_relu_kernel(%arg0: i32, %arg1: i32, %arg2: memref<1x1x2x18x24x4xbf16, #tpu.memory_space<vmem>>, %arg3: memref<36x128xbf16, #tpu.memory_space<vmem>>, %arg4: memref<2x128xf32, #tpu.memory_space<vmem>>, %arg5: memref<1x1x2x16x16x8xbf16, #tpu.memory_space<vmem>>) attributes {dimension_semantics = [#tpu.dimension_semantics<parallel>, #tpu.dimension_semantics<parallel>], iteration_bounds = array<i64: 1, 1>, scalar_prefetch = 0 : i64, scratch_operands = 0 : i64, tpu.core_type = #tpu.core_type<tc>, window_params = [{transform_indices = @transform_0, window_bounds = array<i64: 1, 1, 2, 18, 24, 4>}, {pipeline_mode = #tpu.pipeline_mode<synchronous>, transform_indices = @transform_1, window_bounds = array<i64: 36, 128>}, {pipeline_mode = #tpu.pipeline_mode<synchronous>, transform_indices = @transform_2, window_bounds = array<i64: 2, 128>}, {transform_indices = @transform_3, window_bounds = array<i64: 1, 1, 2, 16, 16, 8>}]} {
    %c0 = arith.constant 0 : index
    %c0_0 = arith.constant 0 : index
    %c0_1 = arith.constant 0 : index
    %c0_2 = arith.constant 0 : index
    %c0_3 = arith.constant 0 : index
    %c0_4 = arith.constant 0 : index
    %0 = vector.load %arg2[%c0, %c0_0, %c0_1, %c0_2, %c0_3, %c0_4] : memref<1x1x2x18x24x4xbf16, #tpu.memory_space<vmem>>, vector<1x1x2x18x24x4xbf16>
    %1 = vector.shape_cast %0 : vector<1x1x2x18x24x4xbf16> to vector<2x18x24x4xbf16>
    %2 = vector.extract_strided_slice %1 {offsets = [0, 0, 0, 0], sizes = [2, 18, 16, 4], strides = [1, 1, 1, 1]} : vector<2x18x24x4xbf16> to vector<2x18x16x4xbf16>
    %3 = vector.extract_strided_slice %1 {offsets = [0, 0, 1, 0], sizes = [2, 18, 16, 4], strides = [1, 1, 1, 1]} : vector<2x18x24x4xbf16> to vector<2x18x16x4xbf16>
    %4 = vector.extract_strided_slice %1 {offsets = [0, 0, 2, 0], sizes = [2, 18, 16, 4], strides = [1, 1, 1, 1]} : vector<2x18x24x4xbf16> to vector<2x18x16x4xbf16>
    %5 = tpu.concatenate %2, %3, %4 in 3 : vector<2x18x16x4xbf16>, vector<2x18x16x4xbf16>, vector<2x18x16x4xbf16> -> vector<2x18x16x12xbf16>
    %6 = vector.extract_strided_slice %5 {offsets = [0, 0, 0, 0], sizes = [2, 16, 16, 12], strides = [1, 1, 1, 1]} : vector<2x18x16x12xbf16> to vector<2x16x16x12xbf16>
    %7 = vector.extract_strided_slice %5 {offsets = [0, 1, 0, 0], sizes = [2, 16, 16, 12], strides = [1, 1, 1, 1]} : vector<2x18x16x12xbf16> to vector<2x16x16x12xbf16>
    %8 = vector.extract_strided_slice %5 {offsets = [0, 2, 0, 0], sizes = [2, 16, 16, 12], strides = [1, 1, 1, 1]} : vector<2x18x16x12xbf16> to vector<2x16x16x12xbf16>
    %9 = tpu.concatenate %6, %7, %8 in 3 : vector<2x16x16x12xbf16>, vector<2x16x16x12xbf16>, vector<2x16x16x12xbf16> -> vector<2x16x16x36xbf16>
    %10 = vector.shape_cast %9 : vector<2x16x16x36xbf16> to vector<512x36xbf16>
    %c0_5 = arith.constant 0 : index
    %c0_6 = arith.constant 0 : index
    %11 = vector.load %arg3[%c0_5, %c0_6] : memref<36x128xbf16, #tpu.memory_space<vmem>>, vector<36x128xbf16>
    %cst = arith.constant dense<0.000000e+00> : vector<512x128xf32>
    %12 = tpu.matmul %10, %11, %cst {dimension_numbers = #tpu.dot_dimension_numbers<[1], [0], [0], [1], [0, 0, 1, 1], [], []>} : vector<512x36xbf16>, vector<36x128xbf16>, vector<512x128xf32> -> vector<512x128xf32>
    %c0_7 = arith.constant 0 : index
    %c0_8 = arith.constant 0 : index
    %13 = vector.load %arg4[%c0_7, %c0_8] : memref<2x128xf32, #tpu.memory_space<vmem>>, vector<1x128xf32>
    %14 = vector.broadcast %13 : vector<1x128xf32> to vector<512x128xf32>
    %15 = arith.mulf %12, %14 : vector<512x128xf32>
    %c1 = arith.constant 1 : index
    %c0_9 = arith.constant 0 : index
    %16 = vector.load %arg4[%c1, %c0_9] : memref<2x128xf32, #tpu.memory_space<vmem>>, vector<1x128xf32>
    %17 = vector.broadcast %16 : vector<1x128xf32> to vector<512x128xf32>
    %18 = arith.addf %15, %17 : vector<512x128xf32>
    %cst_10 = arith.constant 0.000000e+00 : f32
    %19 = vector.broadcast %cst_10 : f32 to vector<512x128xf32>
    %20 = arith.maximumf %18, %19 : vector<512x128xf32>
    %21 = vector.extract_strided_slice %20 {offsets = [0, 0], sizes = [512, 8], strides = [1, 1]} : vector<512x128xf32> to vector<512x8xf32>
    %22 = vector.shape_cast %21 : vector<512x8xf32> to vector<1x1x2x16x16x8xf32>
    %23 = arith.truncf %22 : vector<1x1x2x16x16x8xf32> to vector<1x1x2x16x16x8xbf16>
    %c0_11 = arith.constant 0 : index
    %c0_12 = arith.constant 0 : index
    %c0_13 = arith.constant 0 : index
    %c0_14 = arith.constant 0 : index
    %c0_15 = arith.constant 0 : index
    %c0_16 = arith.constant 0 : index
    %24 = vector.load %arg5[%c0_11, %c0_12, %c0_13, %c0_14, %c0_15, %c0_16] : memref<1x1x2x16x16x8xbf16, #tpu.memory_space<vmem>>, vector<1x1x2x16x16x8xbf16>
    tpu.vector_store %arg5[%c0_11, %c0_12, %c0_13, %c0_14, %c0_15, %c0_16], %23 {strides = array<i32>} : memref<1x1x2x16x16x8xbf16, #tpu.memory_space<vmem>>, vector<1x1x2x16x16x8xbf16>,
    return
  }
  func.func @transform_0(%arg0: i32, %arg1: i32) -> (i32, i32, i32, i32, i32, i32) {
    %c0_i32 = arith.constant 0 : i32
    %c0_i32_0 = arith.constant 0 : i32
    %c0_i32_1 = arith.constant 0 : i32
    %c0_i32_2 = arith.constant 0 : i32
    %c0_i32_3 = arith.constant 0 : i32
    return %arg0, %arg1, %c0_i32, %c0_i32_0, %c0_i32_1, %c0_i32_2 : i32, i32, i32, i32, i32, i32
  }
  func.func @transform_1(%arg0: i32, %arg1: i32) -> (i32, i32) {
    %c0_i32 = arith.constant 0 : i32
    %c0_i32_0 = arith.constant 0 : i32
    %c0_i32_1 = arith.constant 0 : i32
    return %c0_i32, %c0_i32_0 : i32, i32
  }
  func.func @transform_2(%arg0: i32, %arg1: i32) -> (i32, i32) {
    %c0_i32 = arith.constant 0 : i32
    %c0_i32_0 = arith.constant 0 : i32
    %c0_i32_1 = arith.constant 0 : i32
    return %c0_i32, %c0_i32_0 : i32, i32
  }
  func.func @transform_3(%arg0: i32, %arg1: i32) -> (i32, i32, i32, i32, i32, i32) {
    %c0_i32 = arith.constant 0 : i32
    %c0_i32_0 = arith.constant 0 : i32
    %c0_i32_1 = arith.constant 0 : i32
    %c0_i32_2 = arith.constant 0 : i32
    %c0_i32_3 = arith.constant 0 : i32
    return %arg0, %arg1, %c0_i32, %c0_i32_0, %c0_i32_1, %c0_i32_2 : i32, i32, i32, i32, i32, i32
  }
}

</mosaic_0001>

<bundles_post_ra>
// kernel: conv_bn_relu.1
= control target key start
LH: loop header
LB: loop body
LE: loop exit
PB: predicated region body
PF: predicated region fallthrough
CT: control target
= control target key end

     0   :  { %vm916_vm0 = vcmask 1046528   ;;  %vm411_vm1 = vsmask.f32 7424  ;;  %s2884_s26 = smov 8   ;;  %s2885_s8 = smov 4   ;;  %vm1097_vm2 = vcmask 31744   ;;  %s4428_s0 = inlined_call_operand.vmem [shape: bf16[1,1,2,18,24,4], index: 0, kind: input, shape index: {}]   ;;  %s4429_s1 = inlined_call_operand.vmem [shape: bf16[36,128], index: 1, kind: input, shape index: {}]   ;;  %s4430_s2 = inlined_call_operand.vmem [shape: f32[2,128], index: 2, kind: input, shape index: {}]   ;;  %s4431_s3 = inlined_call_operand.vmem [shape: bf16[1,1,2,16,16,8], index: 3, kind: output, shape index: {}]  }
   0x1   :  { %v2794_v0 = vld [vmem:[%s4428_s0 + $0xe4] sm:$0xff]   ;;  %v2795_v1 = vld [vmem:[%s4428_s0 + $0xec] ss:$0 sps:$4 sm:$0xff]   ;;  %v2797_v5 = vld [vmem:[%s4428_s0 + $0x14] ss:$0 sps:$4 sm:$0xff]   ;;  %vm1620_vm3 = vcmask 1041408  }
   0x2   :  { %v2796_v2 = vld [vmem:[%s4428_s0 + $0xc] sm:$0xff]   ;;  %v974_v3 = vrot.slane %v2794_v0, 1  ;;  %v975_v4 = vrot.slane %v2795_v1, 1  ;;  %v2923_v7 = vld [vmem:[%s4428_s0 + $0x18] sm:$0xff]   ;;  %v921_v9 = vrot.slane %v2797_v5, 1  ;;  %v432_v16 = vshll.u32 %v2797_v5, 16 }
   0x3   :  { %v920_v6 = vrot.slane %v2796_v2, 1  ;;  %v2929_v10 = vld [vmem:[%s4428_s0 + $0x20] ss:$0 sps:$4 sm:$0xff]   ;;  %v425_v11 = vshrl.u32 %v2796_v2, 16  ;;  %v427_v12 = vshll.u32 %v2796_v2, 16  ;;  %v2934_v13 = vld [vmem:[%s4428_s0 + $0xf0] sm:$0xff]  }
   0x4   :  { %v976_v8 = vsel %vm916_vm0, %v974_v3, %v975_v4  ;;  %v437_v14 = vshrl.u32 %v2923_v7, 16  ;;  %v439_v15 = vshll.u32 %v2923_v7, 16  ;;  %v641_v17 = vshrl.u32 %v2794_v0, 16  ;;  %v2945_v23 = vld [vmem:[%s4428_s0 + $0xf8] ss:$0 sps:$4 sm:$0xff]   ;;  %v2952_v30 = vld [vmem:[%s4428_s0 + $0xfc] sm:$0xff]  }
   0x5   :  { %1063 = vrot.lane.b32.xlu1 %v976_v8, %s2884_s26  ;;  %v922_v18 = vsel %vm916_vm0, %v920_v6, %v921_v9  ;;  %v444_v19 = vshll.u32 %v2929_v10, 16  ;;  %v429_v20 = vrot.slane %v427_v12, 1  ;;  %v434_v22 = vrot.slane %v432_v16, 1  ;;  %v2959_v37 = vld [vmem:[%s4428_s0 + $0x104] ss:$0 sps:$4 sm:$0xff]   ;;  %v2982_v54 = vld [vmem:[%s4428_s0 + $0x108] sm:$0xff]  }
   0x6   :  { %1027 = vrot.lane.b32.xlu0 %v922_v18, %s2884_s26  ;;  %v441_v21 = vrot.slane %v439_v15, 1  ;;  %v653_v24 = vshrl.u32 %v2934_v13, 16  ;;  %v655_v25 = vshll.u32 %v2934_v13, 16  ;;  %v643_v28 = vshll.u32 %v2794_v0, 16  ;;  %v2965_v39 = vld [vmem:[%s4428_s0 + $0x24] sm:$0xff]   ;;  %v2989_v58 = vld [vmem:[%s4428_s0 + $0x30] sm:$0xff]  }
   0x7   :  { %v446_v26 = vrot.slane %v444_v19, 1  ;;  %v430_v27 = vor.u32 %v429_v20, %v425_v11  ;;  %v648_v29 = vshll.u32 %v2795_v1, 16  ;;  %v660_v33 = vshll.u32 %v2945_v23, 16  ;;  %v2805_v46 = vld [vmem:[%s4428_s0 + $0x2c] ss:$0 sps:$4 sm:$0xff]   ;;  %v3004_v2 = vld [vmem:[%s4428_s0 + $0x114] sm:$0xff]  }
   0x8   :  { %v442_v31 = vor.u32 %v441_v21, %v437_v14  ;;  %v657_v32 = vrot.slane %v655_v25, 1  ;;  %v645_v35 = vrot.slane %v643_v28, 1  ;;  %v665_v38 = vshrl.u32 %v2952_v30, 16  ;;  %v2998_v63 = vld [vmem:[%s4428_s0 + $0x110] ss:$0 sps:$4 sm:$0xff]   ;;  %v3022_v12 = vld [vmem:[%s4428_s0 + $0x3c] sm:$0xff]  }
   0x9   :  { %v435_v34 = vsel %vm411_vm1, %v430_v27, %v434_v22  ;;  %v650_v36 = vrot.slane %v648_v29, 1  ;;  %v662_v42 = vrot.slane %v660_v33, 1  ;;  %v667_v43 = vshll.u32 %v2952_v30, 16  ;;  %v3015_v9 = vld [vmem:[%s4428_s0 + $0x38] ss:$0 sps:$4 sm:$0xff]   ;;  %s2887_s18 = smov 24  }
   0xa   :  { %v447_v40 = vsel %vm411_vm1, %v442_v31, %v446_v26  ;;  %846 = vrot.lane.b32.xlu0 %v435_v34, %s2885_s8  ;;  %v658_v41 = vor.u32 %v657_v32, %v653_v24  ;;  %v646_v44 = vor.u32 %v645_v35, %v641_v17  ;;  %v672_v45 = vshll.u32 %v2959_v37, 16  ;;  %v2811_v21 = vld [vmem:[%s4428_s0 + $0x11c] ss:$0 sps:$4 sm:$0xff]   ;;  %v3038_v26 = vld [vmem:[%s4428_s0 + $0x44] ss:$0 sps:$4 sm:$0xff]  }
   0xb   :  { %848 = vrot.lane.b32.xlu1 %v447_v40, %s2885_s8  ;;  %v669_v48 = vrot.slane %v667_v43, 1  ;;  %v449_v49 = vshrl.u32 %v2965_v39, 16  ;;  %v451_v50 = vshll.u32 %v2965_v39, 16  ;;  %v456_v53 = vshll.u32 %v2805_v46, 16  ;;  %v3059_v43 = vld [vmem:[%s4428_s0 + $0x48] sm:$0xff]  }
   0xc   :  { %v663_v47 = vsel %vm411_vm1, %v658_v41, %v662_v42  ;;  %v651_v51 = vsel %vm411_vm1, %v646_v44, %v650_v36  ;;  %v674_v52 = vrot.slane %v672_v45, 1  ;;  %v977_v57 = vrot.slane %v2934_v13, 1  ;;  %v3050_v36 = vld [vmem:[%s4428_s0 + $0x120] sm:$0xff]   ;;  %v3064_v44 = vld [vmem:[%s4428_s0 + $0x128] ss:$0 sps:$4 sm:$0xff]   ;;  %v3069_v45 = vld [vmem:[%s4428_s0 + $0x12c] sm:$0xff]  }
   0xd   :  { %v670_v55 = vor.u32 %v669_v48, %v665_v38  ;;  %v453_v56 = vrot.slane %v451_v50, 1  ;;  %v458_v59 = vrot.slane %v456_v53, 1  ;;  %v978_v60 = vrot.slane %v2945_v23, 1  ;;  %v3076_v48 = vld [vmem:[%s4428_s0 + $0x50] ss:$0 sps:$4 sm:$0xff]  }
   0xe   :  { %882 = vrot.lane.b32.xlu0 %v651_v51, %s2885_s8  ;;  %v923_v61 = vrot.slane %v2923_v7, 1  ;;  %v924_v62 = vrot.slane %v2929_v10, 1  ;;  %v980_v3 = vrot.slane %v2952_v30, 1  ;;  %v981_v4 = vrot.slane %v2959_v37, 1 }
   0xf   :  { %884 = vrot.lane.b32.xlu1 %v663_v47, %s2885_s8  ;;  %v675_v0 = vsel %vm411_vm1, %v670_v55, %v674_v52  ;;  %v454_v1 = vor.u32 %v453_v56, %v449_v49  ;;  %v677_v5 = vshrl.u32 %v2982_v54, 16  ;;  %v679_v6 = vshll.u32 %v2982_v54, 16 }
  0x10   :  { %v684_v8 = vshll.u32 %v2998_v63, 16  ;;  %v461_v10 = vshrl.u32 %v2989_v58, 16  ;;  %v463_v11 = vshll.u32 %v2989_v58, 16  ;;  %v979_v13 = vsel %vm916_vm0, %v977_v57, %v978_v60  ;;  %v3090_v57 = vld [vmem:[%s4428_s0 + $0x54] sm:$0xff]  }
  0x11   :  { %v459_v7 = vsel %vm411_vm1, %v454_v1, %v458_v59  ;;  %v925_v14 = vsel %vm916_vm0, %v923_v61, %v924_v62  ;;  %v926_v15 = vrot.slane %v2965_v39, 1  ;;  %v681_v16 = vrot.slane %v679_v6, 1  ;;  %v3111_v6 = vld [vmem:[%s4428_s0 + $0x5c] ss:$0 sps:$4 sm:$0xff]  }
  0x12   :  { %850 = vrot.lane.b32.xlu0 %v459_v7, %s2885_s8  ;;  %v927_v17 = vrot.slane %v2805_v46, 1  ;;  %v465_v18 = vrot.slane %v463_v11, 1  ;;  %v468_v19 = vshll.u32 %v3015_v9, 16  ;;  %v691_v20 = vshll.u32 %v3004_v2, 16 }
  0x13   :  { %886 = vrot.lane.b32.xlu1 %v675_v0, %s2885_s8  ;;  %v682_v22 = vor.u32 %v681_v16, %v677_v5  ;;  %v686_v23 = vrot.slane %v684_v8, 1  ;;  %v689_v25 = vshrl.u32 %v3004_v2, 16  ;;  %v696_v29 = vshll.u32 %v2811_v21, 16  ;;  %v3101_v0 = vld [vmem:[%s4428_s0 + $0x134] ss:$0 sps:$4 sm:$0xff]  }
  0x14   :  { %v466_v24 = vor.u32 %v465_v18, %v461_v10  ;;  %v470_v27 = vrot.slane %v468_v19, 1  ;;  %v693_v28 = vrot.slane %v691_v20, 1  ;;  %v475_v30 = vshll.u32 %v3022_v12, 16  ;;  %v3125_v20 = vld [vmem:[%s4428_s0 + $0x138] sm:$0xff]  }
  0x15   :  { %v982_v31 = vsel %vm916_vm0, %v980_v3, %v981_v4  ;;  %v928_v32 = vsel %vm916_vm0, %v926_v15, %v927_v17  ;;  %v473_v33 = vshrl.u32 %v3022_v12, 16  ;;  %v480_v34 = vshll.u32 %v3038_v26, 16 }
  0x16   :  { %1029 = vrot.lane.b32.xlu0 %v925_v14, %s2884_s26  ;;  %v477_v35 = vrot.slane %v475_v30, 1  ;;  %v687_v37 = vsel %vm411_vm1, %v682_v22, %v686_v23  ;;  %v471_v38 = vsel %vm411_vm1, %v466_v24, %v470_v27  ;;  %v694_v39 = vor.u32 %v693_v28, %v689_v25  ;;  %v3134_v27 = vld [vmem:[%s4428_s0 + $0x60] sm:$0xff]  }
  0x17   :  { %1065 = vrot.lane.b32.xlu1 %v979_v13, %s2884_s26  ;;  %v698_v40 = vrot.slane %v696_v29, 1  ;;  %v482_v42 = vrot.slane %v480_v34, 1  ;;  %v983_v46 = vrot.slane %v2982_v54, 1  ;;  %v984_v47 = vrot.slane %v2998_v63, 1  ;;  %v3139_v28 = vld [vmem:[%s4428_s0 + $0x140] ss:$0 sps:$4 sm:$0xff]  }
  0x18   :  { %v478_v41 = vor.u32 %v477_v35, %v473_v33  ;;  %v929_v49 = vrot.slane %v2989_v58, 1  ;;  %v930_v50 = vrot.slane %v3015_v9, 1  ;;  %v986_v51 = vrot.slane %v3004_v2, 1  ;;  %v3156_v35 = vld [vmem:[%s4428_s0 + $0x144] sm:$0xff]  }
  0x19   :  { %v703_v52 = vshll.u32 %v3050_v36, 16  ;;  %v699_v53 = vsel %vm411_vm1, %v694_v39, %v698_v40  ;;  %v987_v55 = vrot.slane %v2811_v21, 1  ;;  %v487_v56 = vshll.u32 %v3059_v43, 16  ;;  %v3164_v39 = vld [vmem:[%s4428_s0 + $0x6c] sm:$0xff]  }
  0x1a   :  { %1031 = vrot.lane.b32.xlu0 %v928_v32, %s2884_s26  ;;  %v483_v54 = vsel %vm411_vm1, %v478_v41, %v482_v42  ;;  %v932_v58 = vrot.slane %v3022_v12, 1  ;;  %v933_v59 = vrot.slane %v3038_v26, 1  ;;  %v701_v60 = vshrl.u32 %v3050_v36, 16 }
  0x1b   :  { %1067 = vrot.lane.b32.xlu1 %v982_v31, %s2884_s26  ;;  %v708_v61 = vshll.u32 %v3064_v44, 16  ;;  %v485_v62 = vshrl.u32 %v3059_v43, 16  ;;  %v492_v63 = vshll.u32 %v3076_v48, 16  ;;  %v705_v1 = vrot.slane %v703_v52, 1  ;;  %v3146_v31 = vld [vmem:[%s4428_s0 + $0x68] ss:$0 sps:$4 sm:$0xff]  }
  0x1c   :  { %v715_v2 = vshll.u32 %v3069_v45, 16  ;;  %v985_v3 = vsel %vm916_vm0, %v983_v46, %v984_v47  ;;  %v931_v4 = vsel %vm916_vm0, %v929_v49, %v930_v50  ;;  %v489_v5 = vrot.slane %v487_v56, 1 }
  0x1d   :  { %v499_v7 = vshll.u32 %v3090_v57, 16  ;;  %v988_v8 = vsel %vm916_vm0, %v986_v51, %v987_v55  ;;  %v710_v9 = vrot.slane %v708_v61, 1  ;;  %v494_v10 = vrot.slane %v492_v63, 1 }
  0x1e   :  { %852 = vrot.lane.b32.xlu0 %v471_v38, %s2885_s8  ;;  %v713_v11 = vshrl.u32 %v3069_v45, 16  ;;  %v706_v12 = vor.u32 %v705_v1, %v701_v60  ;;  %v717_v13 = vrot.slane %v715_v2, 1  ;;  %v720_v14 = vshll.u32 %v3101_v0, 16 }
  0x1f   :  { %888 = vrot.lane.b32.xlu1 %v687_v37, %s2885_s8  ;;  %v497_v15 = vshrl.u32 %v3090_v57, 16  ;;  %v934_v16 = vsel %vm916_vm0, %v932_v58, %v933_v59  ;;  %v490_v17 = vor.u32 %v489_v5, %v485_v62  ;;  %v501_v18 = vrot.slane %v499_v7, 1 }
  0x20   :  { %v504_v19 = vshll.u32 %v3111_v6, 16  ;;  %v711_v21 = vsel %vm411_vm1, %v706_v12, %v710_v9  ;;  %v722_v22 = vrot.slane %v720_v14, 1  ;;  %v718_v24 = vor.u32 %v717_v13, %v713_v11  ;;  %v3210_v11 = vld [vmem:[%s4428_s0 + $0x78] sm:$0xff]   ;;  %v3221_v14 = vld [vmem:[%s4428_s0 + $0x80] ss:$0 sps:$4 sm:$0xff]  }
  0x21   :  { %v495_v23 = vsel %vm411_vm1, %v490_v17, %v494_v10  ;;  %v502_v25 = vor.u32 %v501_v18, %v497_v15  ;;  %v989_v29 = vrot.slane %v3050_v36, 1  ;;  %v727_v30 = vshll.u32 %v3125_v20, 16  ;;  %v3216_v13 = vld [vmem:[%s4428_s0 + $0x158] ss:$0 sps:$4 sm:$0xff]  }
  0x22   :  { %854 = vrot.lane.b32.xlu0 %v483_v54, %s2885_s8  ;;  %v506_v26 = vrot.slane %v504_v19, 1  ;;  %v990_v32 = vrot.slane %v3064_v44, 1  ;;  %v935_v33 = vrot.slane %v3059_v43, 1  ;;  %v936_v34 = vrot.slane %v3076_v48, 1  ;;  %v3187_v54 = vld [vmem:[%s4428_s0 + $0x74] ss:$0 sps:$4 sm:$0xff]  }
  0x23   :  { %890 = vrot.lane.b32.xlu1 %v699_v53, %s2885_s8  ;;  %v723_v36 = vsel %vm411_vm1, %v718_v24, %v722_v22  ;;  %v511_v38 = vshll.u32 %v3134_v27, 16  ;;  %v992_v40 = vrot.slane %v3069_v45, 1  ;;  %v993_v41 = vrot.slane %v3101_v0, 1  ;;  %v3179_v45 = vld [vmem:[%s4428_s0 + $0x14c] ss:$0 sps:$4 sm:$0xff]   ;;  %v3232_v19 = vld [vmem:[%s4428_s0 + $0x15c] sm:$0xff]  }
  0x24   :  { %v507_v37 = vsel %vm411_vm1, %v502_v25, %v506_v26  ;;  %v938_v42 = vrot.slane %v3090_v57, 1  ;;  %v725_v43 = vshrl.u32 %v3125_v20, 16  ;;  %v729_v44 = vrot.slane %v727_v30, 1 }
  0x25   :  { %v732_v46 = vshll.u32 %v3139_v28, 16  ;;  %v991_v47 = vsel %vm916_vm0, %v989_v29, %v990_v32  ;;  %v937_v48 = vsel %vm916_vm0, %v935_v33, %v936_v34  ;;  %v516_v49 = vshll.u32 %v3146_v31, 16  ;;  %v3255_v34 = vld [vmem:[%s4428_s0 + $0x164] ss:$0 sps:$4 sm:$0xff]  }
  0x26   :  { %1033 = vrot.lane.b32.xlu0 %v931_v4, %s2884_s26  ;;  %v739_v50 = vshll.u32 %v3156_v35, 16  ;;  %v939_v51 = vrot.slane %v3111_v6, 1  ;;  %v509_v52 = vshrl.u32 %v3134_v27, 16  ;;  %v513_v53 = vrot.slane %v511_v38, 1  ;;  %v3201_v4 = vld [vmem:[%s4428_s0 + $0x150] sm:$0xff]  }
  0x27   :  { %1069 = vrot.lane.b32.xlu1 %v985_v3, %s2884_s26  ;;  %v523_v55 = vshll.u32 %v3164_v39, 16  ;;  %v994_v56 = vsel %vm916_vm0, %v992_v40, %v993_v41  ;;  %v730_v57 = vor.u32 %v729_v44, %v725_v43  ;;  %v734_v58 = vrot.slane %v732_v46, 1  ;;  %v3263_v41 = vld [vmem:[%s4428_s0 + $0x8c] ss:$0 sps:$4 sm:$0xff]  }
  0x28   :  { %v737_v59 = vshrl.u32 %v3156_v35, 16  ;;  %v518_v60 = vrot.slane %v516_v49, 1  ;;  %v741_v61 = vrot.slane %v739_v50, 1  ;;  %v744_v62 = vshll.u32 %v3179_v45, 16 }
  0x29   :  { %v521_v63 = vshrl.u32 %v3164_v39, 16  ;;  %v940_v0 = vsel %vm916_vm0, %v938_v42, %v939_v51  ;;  %v514_v1 = vor.u32 %v513_v53, %v509_v52  ;;  %v525_v2 = vrot.slane %v523_v55, 1  ;;  %v3277_v55 = vld [vmem:[%s4428_s0 + $0x168] sm:$0xff]  }
  0x2a   :  { %1035 = vrot.lane.b32.xlu0 %v934_v16, %s2884_s26  ;;  %v528_v3 = vshll.u32 %v3187_v54, 16  ;;  %v735_v5 = vsel %vm411_vm1, %v730_v57, %v734_v58  ;;  %v746_v6 = vrot.slane %v744_v62, 1  ;;  %v995_v12 = vrot.slane %v3125_v20, 1  ;;  %v3286_v62 = vld [vmem:[%s4428_s0 + $0x90] sm:$0xff]  }
  0x2b   :  { %1071 = vrot.lane.b32.xlu1 %v988_v8, %s2884_s26  ;;  %v519_v7 = vsel %vm411_vm1, %v514_v1, %v518_v60  ;;  %v742_v8 = vor.u32 %v741_v61, %v737_v59  ;;  %v526_v9 = vor.u32 %v525_v2, %v521_v63  ;;  %v996_v15 = vrot.slane %v3139_v28, 1  ;;  %v3291_v63 = vld [vmem:[%s4428_s0 + $0x170] ss:$0 sps:$4 sm:$0xff]  }
  0x2c   :  { %v530_v10 = vrot.slane %v528_v3, 1  ;;  %v941_v16 = vrot.slane %v3134_v27, 1  ;;  %v942_v17 = vrot.slane %v3146_v31, 1  ;;  %v751_v18 = vshll.u32 %v3201_v4, 16 }
  0x2d   :  { %v747_v20 = vsel %vm411_vm1, %v742_v8, %v746_v6  ;;  %v535_v22 = vshll.u32 %v3210_v11, 16  ;;  %v998_v24 = vrot.slane %v3156_v35, 1  ;;  %v999_v25 = vrot.slane %v3179_v45, 1  ;;  %v3303_v6 = vld [vmem:[%s4428_s0 + $0x98] ss:$0 sps:$4 sm:$0xff]  }
  0x2e   :  { %856 = vrot.lane.b32.xlu0 %v495_v23, %s2885_s8  ;;  %v3240_v23 = vld [vmem:[%s4428_s0 + $0x84] sm:$0xff]   ;;  %v944_v26 = vrot.slane %v3164_v39, 1  ;;  %v749_v28 = vshrl.u32 %v3201_v4, 16  ;;  %v756_v29 = vshll.u32 %v3216_v13, 16  ;;  %v540_v30 = vshll.u32 %v3221_v14, 16 }
  0x2f   :  { %892 = vrot.lane.b32.xlu1 %v711_v21, %s2885_s8  ;;  %v531_v21 = vsel %vm411_vm1, %v526_v9, %v530_v10  ;;  %v997_v31 = vsel %vm916_vm0, %v995_v12, %v996_v15  ;;  %v943_v32 = vsel %vm916_vm0, %v941_v16, %v942_v17  ;;  %v753_v33 = vrot.slane %v751_v18, 1  ;;  %v3316_v12 = vld [vmem:[%s4428_s0 + $0x9c] sm:$0xff]  }
  0x30   :  { %v533_v38 = vshrl.u32 %v3210_v11, 16  ;;  %v537_v40 = vrot.slane %v535_v22, 1  ;;  %v547_v42 = vshll.u32 %v3240_v23, 16  ;;  %v1000_v43 = vsel %vm916_vm0, %v998_v24, %v999_v25 }
  0x31   :  { %v758_v44 = vrot.slane %v756_v29, 1  ;;  %v542_v46 = vrot.slane %v540_v30, 1  ;;  %v768_v45 = vshll.u32 %v3255_v34, 16  ;;  %v545_v50 = vshrl.u32 %v3240_v23, 16  ;;  %v2843_v29 = vld [vmem:[%s4428_s0 + $0x17c] ss:$0 sps:$4 sm:$0xff]  }
  0x32   :  { %858 = vrot.lane.b32.xlu0 %v507_v37, %s2885_s8  ;;  %v945_v37 = vrot.slane %v3187_v54, 1  ;;  %v538_v52 = vor.u32 %v537_v40, %v533_v38  ;;  %v549_v53 = vrot.slane %v547_v42, 1  ;;  %v552_v54 = vshll.u32 %v3263_v41, 16  ;;  %v2845_v30 = vld [vmem:[%s4428_s0 + $0xa4] ss:$0 sps:$4 sm:$0xff]  }
  0x33   :  { %894 = vrot.lane.b32.xlu1 %v723_v36, %s2885_s8  ;;  %v763_v36 = vshll.u32 %v3232_v19, 16  ;;  %v770_v59 = vrot.slane %v768_v45, 1  ;;  %v775_v1 = vshll.u32 %v3277_v55, 16  ;;  %v1002_v2 = vrot.slane %v3216_v13, 1 }
  0x34   :  { %v946_v51 = vsel %vm916_vm0, %v944_v26, %v945_v37  ;;  %v543_v58 = vsel %vm411_vm1, %v538_v52, %v542_v46  ;;  %v550_v60 = vor.u32 %v549_v53, %v545_v50  ;;  %v554_v61 = vrot.slane %v552_v54, 1  ;;  %v3356_v53 = vld [vmem:[%s4428_s0 + $0xa8] sm:$0xff]  }
  0x35   :  { %v765_v49 = vrot.slane %v763_v36, 1  ;;  %v947_v3 = vrot.slane %v3210_v11, 1  ;;  %v559_v10 = vshll.u32 %v3286_v62, 16  ;;  %v1004_v13 = vrot.slane %v3232_v19, 1 }
  0x36   :  { %1037 = vrot.lane.b32.xlu0 %v937_v48, %s2884_s26  ;;  %v754_v48 = vor.u32 %v753_v33, %v749_v28  ;;  %v555_v9 = vsel %vm411_vm1, %v550_v60, %v554_v61  ;;  %v950_v15 = vrot.slane %v3240_v23, 1  ;;  %v951_v16 = vrot.slane %v3263_v41, 1  ;;  %v3373_v61 = vld [vmem:[%s4428_s0 + $0xb0] ss:$0 sps:$4 sm:$0xff]  }
  0x37   :  { %1073 = vrot.lane.b32.xlu1 %v991_v47, %s2884_s26  ;;  %v761_v47 = vshrl.u32 %v3232_v19, 16  ;;  %v773_v17 = vshrl.u32 %v3277_v55, 16  ;;  %v777_v18 = vrot.slane %v775_v1, 1  ;;  %v564_v22 = vshll.u32 %v3303_v6, 16 }
  0x38   :  { %v561_v28 = vrot.slane %v559_v10, 1  ;;  %v569_v36 = vshrl.u32 %v3316_v12, 16  ;;  %v952_v37 = vsel %vm916_vm0, %v950_v15, %v951_v16  ;;  %v576_v46 = vshll.u32 %v2845_v30, 16 }
  0x39   :  { %v766_v57 = vor.u32 %v765_v49, %v761_v47  ;;  %v778_v38 = vor.u32 %v777_v18, %v773_v17  ;;  %v566_v40 = vrot.slane %v564_v22, 1  ;;  %v3350_v49 = vld [vmem:[%s4428_s0 + $0x180] sm:$0xff]   ;;  %v1007_v54 = vrot.slane %v3277_v55, 1  ;;  %v3400_v18 = vld [vmem:[%s4428_s0 + $0x194] ss:$0 sps:$4 sm:$0xff]  }
  0x3a   :  { %1039 = vrot.lane.b32.xlu0 %v940_v0, %s2884_s26  ;;  %v1001_v0 = vrot.slane %v3201_v4, 1  ;;  %v578_v52 = vrot.slane %v576_v46, 1  ;;  %v799_v60 = vshll.u32 %v3350_v49, 16  ;;  %v583_v1 = vshll.u32 %v3356_v53, 16 }
  0x3b   :  { %1075 = vrot.lane.b32.xlu1 %v994_v56, %s2884_s26  ;;  %v759_v56 = vsel %vm411_vm1, %v754_v48, %v758_v44  ;;  %v771_v8 = vsel %vm411_vm1, %v766_v57, %v770_v59  ;;  %v3363_v57 = vld [vmem:[%s4428_s0 + $0x188] ss:$0 sps:$4 sm:$0xff]   ;;  %v954_v59 = vrot.slane %v3303_v6, 1  ;;  %v957_v10 = vrot.slane %v2845_v30, 1 }
  0x3c   :  { %v1003_v25 = vsel %vm916_vm0, %v1001_v0, %v1002_v2  ;;  %v3381_v2 = vld [vmem:[%s4428_s0 + $0x18c] sm:$0xff]   ;;  %v797_v15 = vshrl.u32 %v3350_v49, 16  ;;  %v801_v16 = vrot.slane %v799_v60, 1  ;;  %v588_v17 = vshll.u32 %v3373_v61, 16  ;;  %v3456_v60 = vld [vmem:[%s4428_s0] sm:$0xff]  }
  0x3d   :  { %v811_v22 = vshll.u32 %v3381_v2, 16  ;;  %v809_v30 = vshrl.u32 %v3381_v2, 16  ;;  %vm1170_vm4 = vcmask 64512   ;;  %vm1405_vm5 = vcmask 97280  }
  0x3e   :  { %860 = vrot.lane.b32.xlu0 %v519_v7, %s2885_s8  ;;  %v3308_v7 = vld [vmem:[%s4428_s0 + $0x174] sm:$0xff]   ;;  %vm1470_vm6 = vcmask 195584   ;;  %vm1555_vm7 = vcmask 293888   ;;  %vm2371_vm8 = vcmask 60416  }
  0x3f   :  { %896 = vrot.lane.b32.xlu1 %v735_v5, %s2885_s8  ;;  %v948_v5 = vrot.slane %v3221_v14, 1  ;;  %v1005_v14 = vrot.slane %v3255_v34, 1  ;;  %v787_v24 = vshll.u32 %v3308_v7, 16  ;;  %v785_v34 = vshrl.u32 %v3308_v7, 16 }
  0x40   :  { %v1010_v6 = vrot.slane %v3308_v7, 1 }
  0x41   :  { %v949_v26 = vsel %vm916_vm0, %v947_v3, %v948_v5  ;;  %v789_v41 = vrot.slane %v787_v24, 1  ;;  %v3386_v3 = vld [vmem:[%s4428_s0 + $0xb4] sm:$0xff]   ;;  %v3407_v24 = vld [vmem:[%s4428_s0 + $0xbc] ss:$0 sps:$4 sm:$0xff]  }
  0x42   :  { %862 = vrot.lane.b32.xlu0 %v531_v21, %s2885_s8  ;;  %v557_v21 = vshrl.u32 %v3286_v62, 16 }
  0x43   :  { %898 = vrot.lane.b32.xlu1 %v747_v20, %s2885_s8  ;;  %v780_v20 = vshll.u32 %v3291_v63, 16  ;;  %v790_v48 = vor.u32 %v789_v41, %v785_v34  ;;  %v593_v34 = vshrl.u32 %v3386_v3, 16  ;;  %v3421_v41 = vld [vmem:[%s4428_s0 + $0x198] sm:$0xff]  }
  0x44   :  { %v562_v42 = vor.u32 %v561_v28, %v557_v21  ;;  %v585_v21 = vrot.slane %v583_v1, 1  ;;  %v959_v1 = vrot.slane %v3356_v53, 1 }
  0x45   :  { %v782_v33 = vrot.slane %v780_v20, 1  ;;  %v581_v20 = vshrl.u32 %v3356_v53, 16 }
  0x46   :  { %1041 = vrot.lane.b32.xlu0 %v943_v32, %s2884_s26  ;;  %v1006_v32 = vsel %vm916_vm0, %v1004_v13, %v1005_v14  ;;  %v567_v45 = vsel %vm411_vm1, %v562_v42, %v566_v40  ;;  %v804_v13 = vshll.u32 %v3363_v57, 16  ;;  %v600_v40 = vshll.u32 %v3407_v24, 16  ;;  %v3426_v42 = vld [vmem:[%s4428_s0 + $0xc0] sm:$0xff]  }
  0x47   :  { %1077 = vrot.lane.b32.xlu1 %v997_v31, %s2884_s26  ;;  %v571_v31 = vshll.u32 %v3316_v12, 16  ;;  %v783_v47 = vsel %vm411_vm1, %v778_v38, %v782_v33  ;;  %v816_v33 = vshll.u32 %v3400_v18, 16 }
  0x49   :  { %v573_v44 = vrot.slane %v571_v31, 1  ;;  %v802_v31 = vor.u32 %v801_v16, %v797_v15  ;;  %v1016_v16 = vrot.slane %v3381_v2, 1 }
  0x4a   :  { %1043 = vrot.lane.b32.xlu0 %v946_v51, %s2884_s26 }
  0x4b   :  { %1079 = vrot.lane.b32.xlu1 %v1000_v43, %s2884_s26  ;;  %v792_v43 = vshll.u32 %v2843_v29, 16  ;;  %v574_v51 = vor.u32 %v573_v44, %v569_v36  ;;  %v586_v36 = vor.u32 %v585_v21, %v581_v20  ;;  %v818_v44 = vrot.slane %v816_v33, 1 }
  0x4c   :  { %v415_v20 = vshll.u32 %v3456_v60, 16 }
  0x4d   :  { %v794_v50 = vrot.slane %v792_v43, 1  ;;  %v579_v0 = vsel %vm411_vm1, %v574_v51, %v578_v52  ;;  %v3440_v51 = vld [vmem:[%s4428_s0 + $0xc8] ss:$0 sps:$4 sm:$0xff]   ;;  %v823_v52 = vshll.u32 %v3421_v41, 16 }
  0x4e   :  { %864 = vrot.lane.b32.xlu0 %v543_v58, %s2885_s8  ;;  %v953_v58 = vrot.slane %v3286_v62, 1 }
  0x4f   :  { %900 = vrot.lane.b32.xlu1 %v759_v56, %s2885_s8  ;;  %v1008_v56 = vrot.slane %v3291_v63, 1  ;;  %v795_v63 = vsel %vm411_vm1, %v790_v48, %v794_v50  ;;  %v3435_v50 = vld [vmem:[%s4428_s0 + $0x1a0] ss:$0 sps:$4 sm:$0xff]  }
  0x50   :  { %v955_v14 = vsel %vm916_vm0, %v953_v58, %v954_v59  ;;  %v1013_v58 = vrot.slane %v3350_v49, 1  ;;  %v1014_v59 = vrot.slane %v3363_v57, 1  ;;  %v825_v57 = vrot.slane %v823_v52, 1 }
  0x51   :  { %v1009_v5 = vsel %vm916_vm0, %v1007_v54, %v1008_v56  ;;  %v607_v54 = vshll.u32 %v3426_v42, 16  ;;  %v3447_v56 = vld [vmem:[%s4428_s0 + $0xcc] sm:$0xff]  }
  0x52   :  { %866 = vrot.lane.b32.xlu0 %v555_v9, %s2885_s8  ;;  %v956_v9 = vrot.slane %v3316_v12, 1  ;;  %v619_v15 = vshll.u32 %v3447_v56, 16 }
  0x53   :  { %902 = vrot.lane.b32.xlu1 %v771_v8, %s2885_s8  ;;  %v1011_v8 = vrot.slane %v2843_v29, 1  ;;  %v806_v29 = vrot.slane %v804_v13, 1  ;;  %v609_v13 = vrot.slane %v607_v54, 1 }
  0x54   :  { %v958_v28 = vsel %vm916_vm0, %v956_v9, %v957_v10  ;;  %v612_v9 = vshll.u32 %v3440_v51, 16  ;;  %v605_v10 = vshrl.u32 %v3426_v42, 16 }
  0x55   :  { %v807_v43 = vsel %vm411_vm1, %v802_v31, %v806_v29  ;;  %v3494_v29 = vld [vmem:[%s4428_s0 + $0xd8] sm:$0xff]  }
  0x56   :  { %1045 = vrot.lane.b32.xlu0 %v949_v26, %s2884_s26  ;;  %v1012_v26 = vsel %vm916_vm0, %v1010_v6, %v1011_v8  ;;  %v821_v6 = vshrl.u32 %v3421_v41, 16  ;;  %v828_v8 = vshll.u32 %v3435_v50, 16  ;;  %v614_v31 = vrot.slane %v612_v9, 1 }
  0x57   :  { %1081 = vrot.lane.b32.xlu1 %v1003_v25, %s2884_s26  ;;  %v595_v25 = vshll.u32 %v3386_v3, 16  ;;  %v631_v52 = vshll.u32 %v3494_v29, 16 }
  0x58   :  { %v826_v33 = vor.u32 %v825_v57, %v821_v6  ;;  %v629_v57 = vshrl.u32 %v3494_v29, 16 }
  0x59   :  { %v597_v38 = vrot.slane %v595_v25, 1  ;;  %v962_v25 = vrot.slane %v3386_v3, 1 }
  0x5a   :  { %1047 = vrot.lane.b32.xlu0 %v952_v37, %s2884_s26  ;;  %v813_v37 = vrot.slane %v811_v22, 1  ;;  %v1017_v22 = vrot.slane %v3400_v18, 1  ;;  %v610_v18 = vor.u32 %v609_v13, %v605_v10  ;;  %v633_v10 = vrot.slane %v631_v52, 1 }
  0x5b   :  { %1083 = vrot.lane.b32.xlu1 %v1006_v32, %s2884_s26  ;;  %v590_v32 = vrot.slane %v588_v17, 1  ;;  %v598_v48 = vor.u32 %v597_v38, %v593_v34  ;;  %v3479_v17 = vld [vmem:[%s4428_s0 + $0x8] ss:$0 sps:$4 sm:$0xff]   ;;  %v621_v34 = vrot.slane %v619_v15, 1  ;;  %v417_v38 = vrot.slane %v415_v20, 1 }
  0x5d   :  { %v591_v46 = vsel %vm411_vm1, %v586_v36, %v590_v32  ;;  %v617_v32 = vshrl.u32 %v3447_v56, 16 }
  0x5e   :  { %868 = vrot.lane.b32.xlu0 %v567_v45, %s2885_s8  ;;  %v602_v45 = vrot.slane %v600_v40, 1  ;;  %v420_v40 = vshll.u32 %v3479_v17, 16 }
  0x5f   :  { %904 = vrot.lane.b32.xlu1 %v783_v47, %s2885_s8  ;;  %v814_v47 = vor.u32 %v813_v37, %v809_v30  ;;  %v830_v30 = vrot.slane %v828_v8, 1  ;;  %v413_v37 = vshrl.u32 %v3456_v60, 16 }
  0x61   :  { %v831_v54 = vsel %vm411_vm1, %v826_v33, %v830_v30 }
  0x62   :  { %870 = vrot.lane.b32.xlu0 %v579_v0, %s2885_s8  ;;  %v603_v0 = vsel %vm411_vm1, %v598_v48, %v602_v45  ;;  %v3517_v45 = vld [vmem:[%s4428_s0 + $0xe0] ss:$0 sps:$4 sm:$0xff]  }
  0x63   :  { %906 = vrot.lane.b32.xlu1 %v795_v63, %s2885_s8  ;;  %v819_v63 = vsel %vm411_vm1, %v814_v47, %v818_v44  ;;  %v636_v13 = vshll.u32 %v3517_v45, 16 }
  0x66   :  { %1049 = vrot.lane.b32.xlu0 %v955_v14, %s2884_s26  ;;  %v3469_v14 = vld [vmem:[%s4428_s0 + $0xd4] ss:$0 sps:$4 sm:$0xff]  }
  0x67   :  { %1085 = vrot.lane.b32.xlu1 %v1009_v5, %s2884_s26  ;;  %v960_v5 = vrot.slane %v3373_v61, 1  ;;  %v1015_v61 = vsel %vm916_vm0, %v1013_v58, %v1014_v59  ;;  %v624_v36 = vshll.u32 %v3469_v14, 16  ;;  %v615_v58 = vsel %vm411_vm1, %v610_v18, %v614_v31 }
  0x68   :  { %v622_v59 = vor.u32 %v621_v34, %v617_v32  ;;  %v1019_v31 = vrot.slane %v3421_v41, 1  ;;  %v1020_v32 = vrot.slane %v3435_v50, 1  ;;  %v965_v34 = vrot.slane %v3426_v42, 1 }
  0x69   :  { %v961_v21 = vsel %vm916_vm0, %v959_v1, %v960_v5  ;;  %v422_v1 = vrot.slane %v420_v40, 1  ;;  %v968_v40 = vrot.slane %v3447_v56, 1  ;;  %v969_v50 = vrot.slane %v3469_v14, 1 }
  0x6a   :  { %1051 = vrot.lane.b32.xlu0 %v958_v28, %s2884_s26  ;;  %v3489_v28 = vld [vmem:[%s4428_s0 + $0x1a4] sm:$0xff]  }
  0x6b   :  { %1087 = vrot.lane.b32.xlu1 %v1012_v26, %s2884_s26  ;;  %v963_v26 = vrot.slane %v3407_v24, 1  ;;  %v835_v48 = vshll.u32 %v3489_v28, 16  ;;  %v833_v5 = vshrl.u32 %v3489_v28, 16  ;;  %v970_v14 = vsel %vm916_vm0, %v968_v40, %v969_v50 }
  0x6d   :  { %v964_v47 = vsel %vm916_vm0, %v962_v25, %v963_v26  ;;  %v837_v9 = vrot.slane %v835_v48, 1  ;;  %v634_v25 = vor.u32 %v633_v10, %v629_v57  ;;  %v638_v26 = vrot.slane %v636_v13, 1  ;;  %v2868_v13 = vld [vmem:[%s4429_s1 + $0x10] ss:$0 sps:$4 sm:$0x33]  }
  0x6e   :  { %872 = vrot.lane.b32.xlu0 %v591_v46, %s2885_s8  ;;  %v1018_v46 = vsel %vm916_vm0, %v1016_v16, %v1017_v22  ;;  %v917_v48 = vrot.slane %v3456_v60, 1 }
  0x6f   :  { %908 = vrot.lane.b32.xlu1 %v807_v43, %s2885_s8  ;;  %v3507_v43 = vld [vmem:[%s4428_s0 + $0x1ac] ss:$0 sps:$4 sm:$0xff]   ;;  %v838_v22 = vor.u32 %v837_v9, %v833_v5  ;;  %v639_v18 = vsel %vm411_vm1, %v634_v25, %v638_v26  ;;  %v1622_v25 = vsel %vm1620_vm3, %v2868_v13, 0 }
  0x70   :  { %v840_v6 = vshll.u32 %v3507_v43, 16  ;;  %v2867_v9 = vld [vmem:[%s4429_s1 + $0x8] sm:$0xff]  }
  0x72   :  { %874 = vrot.lane.b32.xlu0 %v603_v0, %s2885_s8  ;;  %v418_v0 = vor.u32 %v417_v38, %v413_v37  ;;  %v842_v16 = vrot.slane %v840_v6, 1 }
  0x73   :  { %910 = vrot.lane.b32.xlu1 %v819_v63, %s2885_s8  ;;  %v626_v63 = vrot.slane %v624_v36, 1  ;;  %v966_v36 = vrot.slane %v3440_v51, 1  ;;  %v918_v51 = vrot.slane %v3479_v17, 1  ;;  %v971_v17 = vrot.slane %v3494_v29, 1 }
  0x74   :  { %v843_v33 = vsel %vm411_vm1, %v838_v22, %v842_v16 }
  0x76   :  { %1053 = vrot.lane.b32.xlu0 %v961_v21, %s2884_s26  ;;  %v423_v21 = vsel %vm411_vm1, %v418_v0, %v422_v1  ;;  %v1023_v0 = vrot.slane %v3507_v43, 1  ;;  %v972_v1 = vrot.slane %v3517_v45, 1 }
  0x77   :  { %1089 = vrot.lane.b32.xlu1 %v1015_v61, %s2884_s26  ;;  %v3500_v24 = vpop.permute.xlu1 %1063  ;;  %v627_v61 = vsel %vm411_vm1, %v622_v59, %v626_v63  ;;  %v1022_v59 = vrot.slane %v3489_v28, 1  ;;  %v919_v63 = vsel %vm916_vm0, %v917_v48, %v918_v51 }
  0x78   :  { %v3509_v44 = vpop.permute.xlu0 %1027  ;;  %v973_v57 = vsel %vm916_vm0, %v971_v17, %v972_v1 }
  0x79   :  { %v1024_v43 = vsel %vm916_vm0, %v1022_v59, %v1023_v0 }
  0x7a   :  { %1055 = vrot.lane.b32.xlu0 %v964_v47, %s2884_s26  ;;  %v967_v47 = vsel %vm916_vm0, %v965_v34, %v966_v36 }
  0x7b   :  { %1091 = vrot.lane.b32.xlu1 %v1018_v46, %s2884_s26  ;;  %v1021_v46 = vsel %vm916_vm0, %v1019_v31, %v1020_v32 }
  0x7c   :  { %v3526_v8 = vpop.permute.xlu0 %846 }
  0x7d   :  { %v3530_v15 = vpop.permute.xlu1 %848 }
  0x7e   :  { %876 = vrot.lane.b32.xlu0 %v615_v58, %s2885_s8  ;;  %v2866_v58 = vld [vmem:[%s4429_s1] sm:$0xff]   ;;  %s2886_s1 = smov 12  }
  0x7f   :  { %912 = vrot.lane.b32.xlu1 %v831_v54, %s2885_s8  ;;  %2712 = vmatprep.subr.bf16.mxu0 %v2866_v58 }
  0x80   :  { %v883_v20 = vpop.permute.xlu0 %882  ;;  %2782 = vmatprep.subr.bf16.mxu1 %v2866_v58  ;;  %2713 = vmatpush3.bf16.msra.mxu0 %v2866_v58 }
  0x81   :  { %v3536_v30 = vpop.permute.xlu1 %884  ;;  %2785 = vmatpush3.bf16.msra.mxu1 %v2866_v58  ;;  %2714 = vmatprep.subr.bf16.mxu0 %v2867_v9 }
  0x82   :  { %844 = vrot.lane.b32.xlu0 %v423_v21, %s2885_s8  ;;  %2783 = vmatprep.subr.bf16.mxu1 %v2867_v9  ;;  %v2870_v21 = vld [vmem:[%s4428_s0 + $0xe4] sm:$0xff]  }
  0x83   :  { %878 = vrot.lane.b32.xlu1 %v627_v61, %s2885_s8  ;;  %v2869_v61 = vld [vmem:[%s4428_s0 + $0xc] sm:$0xff]   ;;  %v1137_v22 = vsel %vm1097_vm2, %v2870_v21, %v883_v20  ;;  %v2871_v20 = vld [vmem:[%s4428_s0 + $0x18] sm:$0xff]  }
  0x84   :  { %v3548_v38 = vpop.permute.xlu0 %850  ;;  %2715 = vmatpush3.bf16.msra.mxu0 %v2867_v9  ;;  %v1101_v16 = vsel %vm1097_vm2, %v2869_v61, %v3526_v8  ;;  %v3592_v8 = vsel %vm1170_vm4, %v1137_v22, %v3500_v24  ;;  %v2872_v24 = vld [vmem:[%s4428_s0 + $0xf0] sm:$0xff]  }
  0x85   :  { %v3546_v37 = vpop.permute.xlu1 %886  ;;  %2786 = vmatpush3.bf16.msra.mxu1 %v2867_v9  ;;  %2788 = vmatprep.subr.msk.bf16.mxu0 %vm1620_vm3, %v2868_v13  ;;  %v3596_v32 = vsel %vm1170_vm4, %v1101_v16, %v3509_v44  ;;  %v1139_v44 = vsel %vm1097_vm2, %v2872_v24, %v3536_v30  ;;  %v2873_v30 = vld [vmem:[%s4428_s0 + $0xfc] sm:$0xff]  }
  0x86   :  { %880 = vrot.lane.b32.xlu0 %v639_v18, %s2885_s8  ;;  %2789 = vmatprep.subr.msk.bf16.mxu1 %vm1620_vm3, %v2868_v13 }
  0x87   :  { %914 = vrot.lane.b32.xlu1 %v843_v33, %s2885_s8  ;;  %v1103_v33 = vsel %vm1097_vm2, %v2871_v20, %v3530_v15 }
  0x88   :  { %v1030_v54 = vpop.permute.xlu0 %1029  ;;  %2717 = vmatpush3.bf16.msra.mxu0 %v1622_v25 }
  0x89   :  { %v1066_v52 = vpop.permute.xlu1 %1065  ;;  %2787 = vmatpush3.bf16.msra.mxu1 %v1622_v25  ;;  %v3616_v40 = vsel %vm1170_vm4, %v1103_v33, %v1030_v54  ;;  %v2880_v33 = vld [vmem:[%s4428_s0 + $0x48] sm:$0xff]  }
  0x8a   :  { %1057 = vrot.lane.b32.xlu0 %v967_v47, %s2884_s26  ;;  %v3613_v36 = vsel %vm1170_vm4, %v1139_v44, %v1066_v52  ;;  %v2874_v47 = vld [vmem:[%s4428_s0 + $0x24] sm:$0xff]  }
  0x8b   :  { %1093 = vrot.lane.b32.xlu1 %v1021_v46, %s2884_s26  ;;  %v1141_v46 = vsel %vm1097_vm2, %v2873_v30, %v3546_v37  ;;  %v1105_v48 = vsel %vm1097_vm2, %v2874_v47, %v3548_v38  ;;  %v2875_v38 = vld [vmem:[%s4428_s0 + $0x108] sm:$0xff]  }
  0x8c   :  { %v1032_v6 = vpop.permute.xlu0 %1031 }
  0x8d   :  { %v1068_v5 = vpop.permute.xlu1 %1067  ;;  %v3640_v58 = vsel %vm1170_vm4, %v1105_v48, %v1032_v6  ;;  %v2882_v48 = vld [vmem:[%s4428_s0 + $0x54] sm:$0xff]  }
  0x8e   :  { %1025 = vrot.lane.b32.xlu0 %v919_v63, %s2884_s26  ;;  %v3637_v54 = vsel %vm1170_vm4, %v1141_v46, %v1068_v5  ;;  %v2876_v63 = vld [vmem:[%s4428_s0 + $0x30] sm:$0xff]  }
  0x8f   :  { %1059 = vrot.lane.b32.xlu1 %v970_v14, %s2884_s26  ;;  %v2881_v46 = vld [vmem:[%s4428_s0 + $0x12c] sm:$0xff]  }
  0x90   :  { %v853_v10 = vpop.permute.xlu0 %852 }
  0x91   :  { %v889_v45 = vpop.permute.xlu1 %888  ;;  %v1107_v0 = vsel %vm1097_vm2, %v2876_v63, %v853_v10  ;;  %v2878_v10 = vld [vmem:[%s4428_s0 + $0x3c] sm:$0xff]  }
  0x92   :  { %1061 = vrot.lane.b32.xlu0 %v973_v57, %s2884_s26  ;;  %v1143_v59 = vsel %vm1097_vm2, %v2875_v38, %v889_v45  ;;  %v2877_v57 = vld [vmem:[%s4428_s0 + $0x114] sm:$0xff]  }
  0x93   :  { %1095 = vrot.lane.b32.xlu1 %v1024_v43, %s2884_s26 }
  0x94   :  { %v855_v31 = vpop.permute.xlu0 %854 }
  0x95   :  { %v891_v26 = vpop.permute.xlu1 %890  ;;  %v1109_v13 = vsel %vm1097_vm2, %v2878_v10, %v855_v31  ;;  %v2879_v31 = vld [vmem:[%s4428_s0 + $0x120] sm:$0xff]  }
  0x96   :  { %1275 = vrot.lane.b32.xlu0 %v3596_v32, %s2886_s1  ;;  %v1145_v45 = vsel %vm1097_vm2, %v2877_v57, %v891_v26 }
  0x97   :  { %1307 = vrot.lane.b32.xlu1 %v3592_v8, %s2886_s1 }
  0x98   :  { %v1034_v34 = vpop.permute.xlu0 %1033 }
  0x99   :  { %v1070_v18 = vpop.permute.xlu1 %1069  ;;  %v3662_v6 = vsel %vm1170_vm4, %v1107_v0, %v1034_v34 }
  0x9a   :  { %1277 = vrot.lane.b32.xlu0 %v3616_v40, %s2886_s1  ;;  %v3659_v5 = vsel %vm1170_vm4, %v1143_v59, %v1070_v18 }
  0x9b   :  { %1309 = vrot.lane.b32.xlu1 %v3613_v36, %s2886_s1 }
  0x9c   :  { %v1036_v50 = vpop.permute.xlu0 %1035 }
  0x9d   :  { %v1072_v15 = vpop.permute.xlu1 %1071  ;;  %v3684_v22 = vsel %vm1170_vm4, %v1109_v13, %v1036_v50 }
  0x9e   :  { %1341 = vrot.lane.b32.xlu0 %v3616_v40, %s2887_s18  ;;  %v3681_v21 = vsel %vm1170_vm4, %v1145_v45, %v1072_v15 }
  0x9f   :  { %1373 = vrot.lane.b32.xlu1 %v3613_v36, %s2887_s18 }
  0xa0   :  { %v857_v52 = vpop.permute.xlu0 %856 }
  0xa1   :  { %v893_v51 = vpop.permute.xlu1 %892  ;;  %v1111_v24 = vsel %vm1097_vm2, %v2880_v33, %v857_v52 }
  0xa2   :  { %1343 = vrot.lane.b32.xlu0 %v3640_v58, %s2887_s18  ;;  %v1147_v20 = vsel %vm1097_vm2, %v2879_v31, %v893_v51 }
  0xa3   :  { %1375 = vrot.lane.b32.xlu1 %v3637_v54, %s2887_s18 }
  0xa4   :  { %v859_v14 = vpop.permute.xlu0 %858 }
  0xa5   :  { %v895_v37 = vpop.permute.xlu1 %894  ;;  %v1113_v51 = vsel %vm1097_vm2, %v2882_v48, %v859_v14  ;;  %v2883_v14 = vld [vmem:[%s4428_s0 + $0x138] sm:$0xff]  }
  0xa6   :  { %1279 = vrot.lane.b32.xlu0 %v3640_v58, %s2886_s1  ;;  %v1149_v47 = vsel %vm1097_vm2, %v2881_v46, %v895_v37 }
  0xa7   :  { %1311 = vrot.lane.b32.xlu1 %v3637_v54, %s2886_s1 }
  0xa8   :  { %v1038_v1 = vpop.permute.xlu0 %1037 }
  0xa9   :  { %v1074_v17 = vpop.permute.xlu1 %1073  ;;  %v3706_v15 = vsel %vm1170_vm4, %v1111_v24, %v1038_v1 }
  0xaa   :  { %1281 = vrot.lane.b32.xlu0 %v3662_v6, %s2886_s1  ;;  %v3703_v34 = vsel %vm1170_vm4, %v1147_v20, %v1074_v17 }
  0xab   :  { %1313 = vrot.lane.b32.xlu1 %v3659_v5, %s2886_s1 }
  0xac   :  { %v1040_v43 = vpop.permute.xlu0 %1039 }
  0xad   :  { %v1076_v9 = vpop.permute.xlu1 %1075  ;;  %v3728_v63 = vsel %vm1170_vm4, %v1113_v51, %v1040_v43 }
  0xae   :  { %1345 = vrot.lane.b32.xlu0 %v3662_v6, %s2887_s18  ;;  %v3725_v59 = vsel %vm1170_vm4, %v1149_v47, %v1076_v9 }
  0xaf   :  { %1377 = vrot.lane.b32.xlu1 %v3659_v5, %s2887_s18 }
  0xb0   :  { %v861_v16 = vpop.permute.xlu0 %860 }
  0xb1   :  { %v897_v61 = vpop.permute.xlu1 %896  ;;  %v1115_v1 = vsel %vm1097_vm2, %v3134_v27, %v861_v16 }
  0xb2   :  { %1347 = vrot.lane.b32.xlu0 %v3684_v22, %s2887_s18  ;;  %v1151_v17 = vsel %vm1097_vm2, %v2883_v14, %v897_v61 }
  0xb3   :  { %1379 = vrot.lane.b32.xlu1 %v3681_v21, %s2887_s18 }
  0xb4   :  { %v863_v26 = vpop.permute.xlu0 %862 }
  0xb5   :  { %v899_v25 = vpop.permute.xlu1 %898  ;;  %v1117_v61 = vsel %vm1097_vm2, %v3164_v39, %v863_v26 }
  0xb6   :  { %1283 = vrot.lane.b32.xlu0 %v3684_v22, %s2886_s1  ;;  %v1153_v27 = vsel %vm1097_vm2, %v3156_v35, %v899_v25 }
  0xb7   :  { %1315 = vrot.lane.b32.xlu1 %v3681_v21, %s2886_s1 }
  0xb8   :  { %v1042_v18 = vpop.permute.xlu0 %1041 }
  0xb9   :  { %v1078_v44 = vpop.permute.xlu1 %1077  ;;  %v3748_v45 = vsel %vm1170_vm4, %v1115_v1, %v1042_v18 }
  0xba   :  { %1285 = vrot.lane.b32.xlu0 %v3706_v15, %s2886_s1  ;;  %v3745_v57 = vsel %vm1170_vm4, %v1151_v17, %v1078_v44 }
  0xbb   :  { %1317 = vrot.lane.b32.xlu1 %v3703_v34, %s2886_s1 }
  0xbc   :  { %v1044_v30 = vpop.permute.xlu0 %1043 }
  0xbd   :  { %v1080_v50 = vpop.permute.xlu1 %1079  ;;  %v3766_v33 = vsel %vm1170_vm4, %v1117_v61, %v1044_v30 }
  0xbe   :  { %1349 = vrot.lane.b32.xlu0 %v3706_v15, %s2887_s18  ;;  %v3763_v20 = vsel %vm1170_vm4, %v1153_v27, %v1080_v50 }
  0xbf   :  { %1381 = vrot.lane.b32.xlu1 %v3703_v34, %s2887_s18 }
  0xc0   :  { %v865_v38 = vpop.permute.xlu0 %864 }
  0xc1   :  { %v901_v52 = vpop.permute.xlu1 %900  ;;  %v1119_v39 = vsel %vm1097_vm2, %v3210_v11, %v865_v38 }
  0xc2   :  { %1351 = vrot.lane.b32.xlu0 %v3728_v63, %s2887_s18  ;;  %v1155_v35 = vsel %vm1097_vm2, %v3201_v4, %v901_v52 }
  0xc3   :  { %1383 = vrot.lane.b32.xlu1 %v3725_v59, %s2887_s18 }
  0xc4   :  { %v867_v0 = vpop.permute.xlu0 %866 }
  0xc5   :  { %v903_v37 = vpop.permute.xlu1 %902  ;;  %v1121_v11 = vsel %vm1097_vm2, %v3240_v23, %v867_v0 }
  0xc6   :  { %1287 = vrot.lane.b32.xlu0 %v3728_v63, %s2886_s1  ;;  %v1157_v4 = vsel %vm1097_vm2, %v3232_v19, %v903_v37 }
  0xc7   :  { %1319 = vrot.lane.b32.xlu1 %v3725_v59, %s2886_s1 }
  0xc8   :  { %v1046_v43 = vpop.permute.xlu0 %1045 }
  0xc9   :  { %v1082_v9 = vpop.permute.xlu1 %1081  ;;  %v3784_v50 = vsel %vm1170_vm4, %v1119_v39, %v1046_v43 }
  0xca   :  { %1289 = vrot.lane.b32.xlu0 %v3748_v45, %s2886_s1  ;;  %v3781_v18 = vsel %vm1170_vm4, %v1155_v35, %v1082_v9 }
  0xcb   :  { %1321 = vrot.lane.b32.xlu1 %v3745_v57, %s2886_s1 }
  0xcc   :  { %v1048_v13 = vpop.permute.xlu0 %1047 }
  0xcd   :  { %v1084_v10 = vpop.permute.xlu1 %1083  ;;  %v3802_v52 = vsel %vm1170_vm4, %v1121_v11, %v1048_v13 }
  0xce   :  { %1353 = vrot.lane.b32.xlu0 %v3748_v45, %s2887_s18  ;;  %v3799_v51 = vsel %vm1170_vm4, %v1157_v4, %v1084_v10 }
  0xcf   :  { %1385 = vrot.lane.b32.xlu1 %v3745_v57, %s2887_s18 }
  0xd0   :  { %v869_v31 = vpop.permute.xlu0 %868 }
  0xd1   :  { %v905_v16 = vpop.permute.xlu1 %904  ;;  %v1123_v23 = vsel %vm1097_vm2, %v3286_v62, %v869_v31 }
  0xd2   :  { %1355 = vrot.lane.b32.xlu0 %v3766_v33, %s2887_s18  ;;  %v1159_v19 = vsel %vm1097_vm2, %v3277_v55, %v905_v16 }
  0xd3   :  { %1387 = vrot.lane.b32.xlu1 %v3763_v20, %s2887_s18 }
  0xd4   :  { %v871_v44 = vpop.permute.xlu0 %870 }
  0xd5   :  { %v907_v24 = vpop.permute.xlu1 %906  ;;  %v1125_v62 = vsel %vm1097_vm2, %v3316_v12, %v871_v44 }
  0xd6   :  { %1291 = vrot.lane.b32.xlu0 %v3766_v33, %s2886_s1  ;;  %v1161_v55 = vsel %vm1097_vm2, %v3308_v7, %v907_v24 }
  0xd7   :  { %1323 = vrot.lane.b32.xlu1 %v3763_v20, %s2886_s1 }
  0xd8   :  { %v1050_v26 = vpop.permute.xlu0 %1049 }
  0xd9   :  { %v1086_v25 = vpop.permute.xlu1 %1085  ;;  %v3820_v1 = vsel %vm1170_vm4, %v1123_v23, %v1050_v26 }
  0xda   :  { %1293 = vrot.lane.b32.xlu0 %v3784_v50, %s2886_s1  ;;  %v3817_v17 = vsel %vm1170_vm4, %v1159_v19, %v1086_v25 }
  0xdb   :  { %1325 = vrot.lane.b32.xlu1 %v3781_v18, %s2886_s1 }
  0xdc   :  { %v1052_v46 = vpop.permute.xlu0 %1051 }
  0xdd   :  { %v1088_v30 = vpop.permute.xlu1 %1087  ;;  %v3838_v61 = vsel %vm1170_vm4, %v1125_v62, %v1052_v46 }
  0xde   :  { %1357 = vrot.lane.b32.xlu0 %v3784_v50, %s2887_s18  ;;  %v3835_v27 = vsel %vm1170_vm4, %v1161_v55, %v1088_v30 }
  0xdf   :  { %1389 = vrot.lane.b32.xlu1 %v3781_v18, %s2887_s18 }
  0xe0   :  { %v873_v48 = vpop.permute.xlu0 %872 }
  0xe1   :  { %v909_v47 = vpop.permute.xlu1 %908  ;;  %v1127_v12 = vsel %vm1097_vm2, %v3356_v53, %v873_v48 }
  0xe2   :  { %1359 = vrot.lane.b32.xlu0 %v3802_v52, %s2887_s18  ;;  %v1163_v7 = vsel %vm1097_vm2, %v3350_v49, %v909_v47 }
  0xe3   :  { %1391 = vrot.lane.b32.xlu1 %v3799_v51, %s2887_s18 }
  0xe4   :  { %v875_v14 = vpop.permute.xlu0 %874 }
  0xe5   :  { %v911_v38 = vpop.permute.xlu1 %910  ;;  %v1129_v53 = vsel %vm1097_vm2, %v3386_v3, %v875_v14 }
  0xe6   :  { %1295 = vrot.lane.b32.xlu0 %v3802_v52, %s2886_s1  ;;  %v1165_v49 = vsel %vm1097_vm2, %v3381_v2, %v911_v38 }
  0xe7   :  { %1327 = vrot.lane.b32.xlu1 %v3799_v51, %s2886_s1 }
  0xe8   :  { %v1054_v0 = vpop.permute.xlu0 %1053 }
  0xe9   :  { %v1090_v37 = vpop.permute.xlu1 %1089  ;;  %v3856_v39 = vsel %vm1170_vm4, %v1127_v12, %v1054_v0 }
  0xea   :  { %1297 = vrot.lane.b32.xlu0 %v3820_v1, %s2886_s1  ;;  %v3853_v35 = vsel %vm1170_vm4, %v1163_v7, %v1090_v37 }
  0xeb   :  { %1329 = vrot.lane.b32.xlu1 %v3817_v17, %s2886_s1 }
  0xec   :  { %v1056_v43 = vpop.permute.xlu0 %1055 }
  0xed   :  { %v1092_v9 = vpop.permute.xlu1 %1091  ;;  %v3874_v11 = vsel %vm1170_vm4, %v1129_v53, %v1056_v43 }
  0xee   :  { %1361 = vrot.lane.b32.xlu0 %v3820_v1, %s2887_s18  ;;  %v3871_v4 = vsel %vm1170_vm4, %v1165_v49, %v1092_v9 }
  0xef   :  { %1393 = vrot.lane.b32.xlu1 %v3817_v17, %s2887_s18 }
  0xf0   :  { %v877_v13 = vpop.permute.xlu0 %876 }
  0xf1   :  { %v913_v10 = vpop.permute.xlu1 %912  ;;  %v1131_v3 = vsel %vm1097_vm2, %v3426_v42, %v877_v13 }
  0xf2   :  { %1363 = vrot.lane.b32.xlu0 %v3838_v61, %s2887_s18  ;;  %v1167_v2 = vsel %vm1097_vm2, %v3421_v41, %v913_v10 }
  0xf3   :  { %1395 = vrot.lane.b32.xlu1 %v3835_v27, %s2887_s18 }
  0xf4   :  { %v845_v31 = vpop.permute.xlu0 %844 }
  0xf5   :  { %v879_v16 = vpop.permute.xlu1 %878  ;;  %v1099_v9 = vsel %vm1097_vm2, %v3456_v60, %v845_v31 }
  0xf6   :  { %1299 = vrot.lane.b32.xlu0 %v3838_v61, %s2886_s1  ;;  %v1133_v55 = vsel %vm1097_vm2, %v3447_v56, %v879_v16 }
  0xf7   :  { %1331 = vrot.lane.b32.xlu1 %v3835_v27, %s2886_s1 }
  0xf8   :  { %v881_v44 = vpop.permute.xlu0 %880 }
  0xf9   :  { %v915_v24 = vpop.permute.xlu1 %914  ;;  %v1135_v41 = vsel %vm1097_vm2, %v3494_v29, %v881_v44 }
  0xfa   :  { %1301 = vrot.lane.b32.xlu0 %v3856_v39, %s2886_s1  ;;  %v1169_v62 = vsel %vm1097_vm2, %v3489_v28, %v915_v24 }
  0xfb   :  { %1333 = vrot.lane.b32.xlu1 %v3853_v35, %s2886_s1 }
  0xfc   :  { %v1058_v26 = vpop.permute.xlu0 %1057 }
  0xfd   :  { %v1094_v25 = vpop.permute.xlu1 %1093  ;;  %v1204_v23 = vsel %vm1170_vm4, %v1131_v3, %v1058_v26 }
  0xfe   :  { %1365 = vrot.lane.b32.xlu0 %v3856_v39, %s2887_s18  ;;  %v1240_v19 = vsel %vm1170_vm4, %v1167_v2, %v1094_v25 }
  0xff   :  { %1397 = vrot.lane.b32.xlu1 %v3853_v35, %s2887_s18 }
 0x100   :  { %v1026_v46 = vpop.permute.xlu0 %1025 }
 0x101   :  { %v1060_v30 = vpop.permute.xlu1 %1059  ;;  %v1172_v42 = vsel %vm1170_vm4, %v1099_v9, %v1026_v46 }
 0x102   :  { %1367 = vrot.lane.b32.xlu0 %v3874_v11, %s2887_s18  ;;  %v1206_v31 = vsel %vm1170_vm4, %v1133_v55, %v1060_v30 }
 0x103   :  { %1399 = vrot.lane.b32.xlu1 %v3871_v4, %s2887_s18 }
 0x104   :  { %v1062_v48 = vpop.permute.xlu0 %1061 }
 0x105   :  { %v1096_v47 = vpop.permute.xlu1 %1095  ;;  %v1208_v43 = vsel %vm1170_vm4, %v1135_v41, %v1062_v48 }
 0x106   :  { %1303 = vrot.lane.b32.xlu0 %v3874_v11, %s2886_s1  ;;  %v1242_v7 = vsel %vm1170_vm4, %v1169_v62, %v1096_v47 }
 0x107   :  { %1335 = vrot.lane.b32.xlu1 %v3871_v4, %s2886_s1 }
 0x108   :  { %v1276_v14 = vpop.permute.xlu0 %1275 }
 0x109   :  { %v1308_v38 = vpop.permute.xlu1 %1307  ;;  %v1407_v29 = vsel %vm1405_vm5, %v1172_v42, %v1276_v14 }
 0x10a   :  { %1305 = vrot.lane.b32.xlu0 %v1204_v23, %s2886_s1  ;;  %v1439_v60 = vsel %vm1405_vm5, %v1208_v43, %v1308_v38 }
 0x10b   :  { %1337 = vrot.lane.b32.xlu1 %v1240_v19, %s2886_s1 }
 0x10c   :  { %v1278_v0 = vpop.permute.xlu0 %1277 }
 0x10d   :  { %v1310_v37 = vpop.permute.xlu1 %1309  ;;  %v1409_v28 = vsel %vm1405_vm5, %v3596_v32, %v1278_v0 }
 0x10e   :  { %1369 = vrot.lane.b32.xlu0 %v1204_v23, %s2887_s18  ;;  %v1441_v56 = vsel %vm1405_vm5, %v3592_v8, %v1310_v37 }
 0x10f   :  { %1401 = vrot.lane.b32.xlu1 %v1240_v19, %s2887_s18 }
 0x110   :  { %v1342_v13 = vpop.permute.xlu0 %1341 }
 0x111   :  { %v1374_v10 = vpop.permute.xlu1 %1373  ;;  %v1472_v12 = vsel %vm1470_vm6, %v1407_v29, %v1342_v13 }
 0x112   :  { %v1504_v44 = vsel %vm1470_vm6, %v1439_v60, %v1374_v10  ;;  %1371 = vrot.lane.b32.xlu0 %v1206_v31, %s2887_s18  ;;  %2718 = vmatprep.mubr.msk.bf16.mxu0 %vm1555_vm7, %v1472_v12 }
 0x113   :  { %1403 = vrot.lane.b32.xlu1 %v1242_v7, %s2887_s18  ;;  %2750 = vmatprep.mubr.msk.bf16.mxu1 %vm1555_vm7, %v1504_v44 }
 0x114   :  { %v1344_v24 = vpop.permute.xlu0 %1343 }
 0x115   :  { %v1376_v16 = vpop.permute.xlu1 %1375  ;;  %v1474_v26 = vsel %vm1470_vm6, %v1409_v28, %v1344_v24 }
 0x116   :  { %v1506_v25 = vsel %vm1470_vm6, %v1441_v56, %v1376_v16  ;;  %2719 = vmatmul.mubr.msk.bf16.vlgmr.msra.gmra.mrb[0].mxu0 %vm1555_vm7, %v1474_v26 }
 0x117   :  { %2751 = vmatmul.mubr.msk.bf16.vlgmr.msra.gmra.mrb[0].mxu1 %vm1555_vm7, %v1506_v25 }
 0x118   :  { %v1280_v53 = vpop.permute.xlu0 %1279 }
 0x119   :  { %v1312_v49 = vpop.permute.xlu1 %1311  ;;  %v1411_v32 = vsel %vm1405_vm5, %v3616_v40, %v1280_v53 }
 0x11a   :  { %v1443_v8 = vsel %vm1405_vm5, %v3613_v36, %v1312_v49 }
 0x11c   :  { %v1282_v46 = vpop.permute.xlu0 %1281 }
 0x11d   :  { %v1314_v30 = vpop.permute.xlu1 %1313  ;;  %v1413_v14 = vsel %vm1405_vm5, %v3640_v58, %v1282_v46 }
 0x11e   :  { %v1445_v38 = vsel %vm1405_vm5, %v3637_v54, %v1314_v30 }
 0x120   :  { %v1346_v48 = vpop.permute.xlu0 %1345 }
 0x121   :  { %v1378_v47 = vpop.permute.xlu1 %1377  ;;  %v1476_v3 = vsel %vm1470_vm6, %v1411_v32, %v1346_v48 }
 0x122   :  { %v1508_v2 = vsel %vm1470_vm6, %v1443_v8, %v1378_v47  ;;  %2722 = vmatprep.mubr.msk.bf16.mxu0 %vm1555_vm7, %v1476_v3 }
 0x123   :  { %2754 = vmatprep.mubr.msk.bf16.mxu1 %vm1555_vm7, %v1508_v2 }
 0x124   :  { %v1348_v19 = vpop.permute.xlu0 %1347 }
 0x125   :  { %v1380_v36 = vpop.permute.xlu1 %1379  ;;  %v1478_v23 = vsel %vm1470_vm6, %v1413_v14, %v1348_v19 }
 0x126   :  { %v1510_v40 = vsel %vm1470_vm6, %v1445_v38, %v1380_v36  ;;  %2723 = vmatmul.mubr.msk.bf16.gmra.mrb[4].mxu0 %vm1555_vm7, %v1478_v23 }
 0x127   :  { %2755 = vmatmul.mubr.msk.bf16.gmra.mrb[4].mxu1 %vm1555_vm7, %v1510_v40 }
 0x128   :  { %v1284_v0 = vpop.permute.xlu0 %1283 }
 0x129   :  { %v1316_v37 = vpop.permute.xlu1 %1315  ;;  %v1415_v58 = vsel %vm1405_vm5, %v3662_v6, %v1284_v0 }
 0x12a   :  { %v1447_v54 = vsel %vm1405_vm5, %v3659_v5, %v1316_v37 }
 0x12c   :  { %v1286_v41 = vpop.permute.xlu0 %1285 }
 0x12d   :  { %v1318_v9 = vpop.permute.xlu1 %1317  ;;  %v1417_v29 = vsel %vm1405_vm5, %v3684_v22, %v1286_v41 }
 0x12e   :  { %v1449_v60 = vsel %vm1405_vm5, %v3681_v21, %v1318_v9 }
 0x130   :  { %v1350_v43 = vpop.permute.xlu0 %1349 }
 0x131   :  { %v1382_v42 = vpop.permute.xlu1 %1381  ;;  %v1480_v62 = vsel %vm1470_vm6, %v1415_v58, %v1350_v43 }
 0x132   :  { %v1512_v55 = vsel %vm1470_vm6, %v1447_v54, %v1382_v42  ;;  %2726 = vmatprep.mubr.msk.bf16.mxu0 %vm1555_vm7, %v1480_v62 }
 0x133   :  { %2758 = vmatprep.mubr.msk.bf16.mxu1 %vm1555_vm7, %v1512_v55 }
 0x134   :  { %v1352_v10 = vpop.permute.xlu0 %1351 }
 0x135   :  { %v1384_v5 = vpop.permute.xlu1 %1383  ;;  %v1482_v13 = vsel %vm1470_vm6, %v1417_v29, %v1352_v10 }
 0x136   :  { %v1514_v6 = vsel %vm1470_vm6, %v1449_v60, %v1384_v5  ;;  %2727 = vmatmul.mubr.msk.bf16.gmra.mrb[8].mxu0 %vm1555_vm7, %v1482_v13 }
 0x137   :  { %2759 = vmatmul.mubr.msk.bf16.gmra.mrb[8].mxu1 %vm1555_vm7, %v1514_v6 }
 0x138   :  { %v1288_v7 = vpop.permute.xlu0 %1287 }
 0x139   :  { %v1320_v31 = vpop.permute.xlu1 %1319  ;;  %v1419_v22 = vsel %vm1405_vm5, %v3706_v15, %v1288_v7 }
 0x13a   :  { %v1451_v21 = vsel %vm1405_vm5, %v3703_v34, %v1320_v31 }
 0x13c   :  { %v1290_v44 = vpop.permute.xlu0 %1289 }
 0x13d   :  { %v1322_v12 = vpop.permute.xlu1 %1321  ;;  %v1421_v26 = vsel %vm1405_vm5, %v3728_v63, %v1290_v44 }
 0x13e   :  { %v1453_v25 = vsel %vm1405_vm5, %v3725_v59, %v1322_v12 }
 0x140   :  { %v1354_v28 = vpop.permute.xlu0 %1353 }
 0x141   :  { %v1386_v56 = vpop.permute.xlu1 %1385  ;;  %v1484_v24 = vsel %vm1470_vm6, %v1419_v22, %v1354_v28 }
 0x142   :  { %v1516_v16 = vsel %vm1470_vm6, %v1451_v21, %v1386_v56  ;;  %2730 = vmatprep.mubr.msk.bf16.mxu0 %vm1555_vm7, %v1484_v24 }
 0x143   :  { %2762 = vmatprep.mubr.msk.bf16.mxu1 %vm1555_vm7, %v1516_v16 }
 0x144   :  { %v1356_v49 = vpop.permute.xlu0 %1355 }
 0x145   :  { %v1388_v34 = vpop.permute.xlu1 %1387  ;;  %v1486_v53 = vsel %vm1470_vm6, %v1421_v26, %v1356_v49 }
 0x146   :  { %v1518_v15 = vsel %vm1470_vm6, %v1453_v25, %v1388_v34  ;;  %2731 = vmatmul.mubr.msk.bf16.gmra.mrb[12].mxu0 %vm1555_vm7, %v1486_v53 }
 0x147   :  { %2763 = vmatmul.mubr.msk.bf16.gmra.mrb[12].mxu1 %vm1555_vm7, %v1518_v15 }
 0x148   :  { %v1292_v46 = vpop.permute.xlu0 %1291 }
 0x149   :  { %v1324_v30 = vpop.permute.xlu1 %1323  ;;  %v1423_v63 = vsel %vm1405_vm5, %v3748_v45, %v1292_v46 }
 0x14a   :  { %v1455_v59 = vsel %vm1405_vm5, %v3745_v57, %v1324_v30 }
 0x14c   :  { %v1294_v32 = vpop.permute.xlu0 %1293 }
 0x14d   :  { %v1326_v8 = vpop.permute.xlu1 %1325  ;;  %v1425_v14 = vsel %vm1405_vm5, %v3766_v33, %v1294_v32 }
 0x14e   :  { %v1457_v38 = vsel %vm1405_vm5, %v3763_v20, %v1326_v8  ;;  %v4037_v8 = vld [vmem:[%s4430_s2] ss:$0 sm:$0xff] }
 0x150   :  { %v1358_v48 = vpop.permute.xlu0 %1357 }
 0x151   :  { %v1390_v47 = vpop.permute.xlu1 %1389  ;;  %v1488_v3 = vsel %vm1470_vm6, %v1423_v63, %v1358_v48 }
 0x152   :  { %v1520_v2 = vsel %vm1470_vm6, %v1455_v59, %v1390_v47  ;;  %2734 = vmatprep.mubr.msk.bf16.mxu0 %vm1555_vm7, %v1488_v3 }
 0x153   :  { %2766 = vmatprep.mubr.msk.bf16.mxu1 %vm1555_vm7, %v1520_v2 }
 0x154   :  { %v1360_v36 = vpop.permute.xlu0 %1359 }
 0x155   :  { %v1392_v57 = vpop.permute.xlu1 %1391  ;;  %v1490_v19 = vsel %vm1470_vm6, %v1425_v14, %v1360_v36 }
 0x156   :  { %v1522_v45 = vsel %vm1470_vm6, %v1457_v38, %v1392_v57  ;;  %2735 = vmatmul.mubr.msk.bf16.gmra.mrb[16].mxu0 %vm1555_vm7, %v1490_v19 }
 0x157   :  { %2767 = vmatmul.mubr.msk.bf16.gmra.mrb[16].mxu1 %vm1555_vm7, %v1522_v45 }
 0x158   :  { %v1296_v23 = vpop.permute.xlu0 %1295 }
 0x159   :  { %v1328_v40 = vpop.permute.xlu1 %1327  ;;  %v1427_v33 = vsel %vm1405_vm5, %v3784_v50, %v1296_v23 }
 0x15a   :  { %v1459_v20 = vsel %vm1405_vm5, %v3781_v18, %v1328_v40 }
 0x15c   :  { %v1298_v0 = vpop.permute.xlu0 %1297 }
 0x15d   :  { %v1330_v37 = vpop.permute.xlu1 %1329  ;;  %v1429_v43 = vsel %vm1405_vm5, %v3802_v52, %v1298_v0 }
 0x15e   :  { %v1461_v42 = vsel %vm1405_vm5, %v3799_v51, %v1330_v37 }
 0x160   :  { %v1362_v41 = vpop.permute.xlu0 %1361 }
 0x161   :  { %v1394_v9 = vpop.permute.xlu1 %1393  ;;  %v1492_v58 = vsel %vm1470_vm6, %v1427_v33, %v1362_v41 }
 0x162   :  { %v1524_v54 = vsel %vm1470_vm6, %v1459_v20, %v1394_v9  ;;  %2738 = vmatprep.mubr.msk.bf16.mxu0 %vm1555_vm7, %v1492_v58 }
 0x163   :  { %2770 = vmatprep.mubr.msk.bf16.mxu1 %vm1555_vm7, %v1524_v54 }
 0x164   :  { %v1364_v55 = vpop.permute.xlu0 %1363 }
 0x165   :  { %v1396_v18 = vpop.permute.xlu1 %1395  ;;  %v1494_v62 = vsel %vm1470_vm6, %v1429_v43, %v1364_v55 }
 0x166   :  { %v1526_v50 = vsel %vm1470_vm6, %v1461_v42, %v1396_v18  ;;  %2739 = vmatmul.mubr.msk.bf16.gmra.mrb[20].mxu0 %vm1555_vm7, %v1494_v62 }
 0x167   :  { %2771 = vmatmul.mubr.msk.bf16.gmra.mrb[20].mxu1 %vm1555_vm7, %v1526_v50 }
 0x168   :  { %v1300_v29 = vpop.permute.xlu0 %1299 }
 0x169   :  { %v1332_v60 = vpop.permute.xlu1 %1331  ;;  %v1431_v52 = vsel %vm1405_vm5, %v3820_v1, %v1300_v29 }
 0x16a   :  { %v1463_v51 = vsel %vm1405_vm5, %v3817_v17, %v1332_v60 }
 0x16c   :  { %v1302_v10 = vpop.permute.xlu0 %1301 }
 0x16d   :  { %v1334_v5 = vpop.permute.xlu1 %1333  ;;  %v1433_v44 = vsel %vm1405_vm5, %v3838_v61, %v1302_v10 }
 0x16e   :  { %v1465_v12 = vsel %vm1405_vm5, %v3835_v27, %v1334_v5 }
 0x170   :  { %v1366_v13 = vpop.permute.xlu0 %1365 }
 0x171   :  { %v1398_v6 = vpop.permute.xlu1 %1397  ;;  %v1496_v7 = vsel %vm1470_vm6, %v1431_v52, %v1366_v13 }
 0x172   :  { %v1528_v31 = vsel %vm1470_vm6, %v1463_v51, %v1398_v6  ;;  %2742 = vmatprep.mubr.msk.bf16.mxu0 %vm1555_vm7, %v1496_v7 }
 0x173   :  { %2774 = vmatprep.mubr.msk.bf16.mxu1 %vm1555_vm7, %v1528_v31 }
 0x174   :  { %v1368_v21 = vpop.permute.xlu0 %1367 }
 0x175   :  { %v1400_v17 = vpop.permute.xlu1 %1399  ;;  %v1498_v22 = vsel %vm1470_vm6, %v1433_v44, %v1368_v21 }
 0x176   :  { %v1530_v1 = vsel %vm1470_vm6, %v1465_v12, %v1400_v17  ;;  %2743 = vmatmul.mubr.msk.bf16.gmra.mrb[24].mxu0 %vm1555_vm7, %v1498_v22 }
 0x177   :  { %2775 = vmatmul.mubr.msk.bf16.gmra.mrb[24].mxu1 %vm1555_vm7, %v1530_v1 }
 0x178   :  { %v1304_v28 = vpop.permute.xlu0 %1303 }
 0x179   :  { %v1336_v56 = vpop.permute.xlu1 %1335  ;;  %v1435_v61 = vsel %vm1405_vm5, %v3856_v39, %v1304_v28 }
 0x17a   :  { %v1467_v27 = vsel %vm1405_vm5, %v3853_v35, %v1336_v56 }
 0x17c   :  { %v1306_v24 = vpop.permute.xlu0 %1305 }
 0x17d   :  { %v1338_v16 = vpop.permute.xlu1 %1337  ;;  %v1437_v53 = vsel %vm1405_vm5, %v3874_v11, %v1306_v24 }
 0x17e   :  { %v1469_v15 = vsel %vm1405_vm5, %v3871_v4, %v1338_v16  ;;  %v4042_v4 = vld [vmem:[%s4430_s2 + $0x1] ss:$0 sm:$0xff] }
 0x180   :  { %v1370_v26 = vpop.permute.xlu0 %1369 }
 0x181   :  { %v1402_v25 = vpop.permute.xlu1 %1401  ;;  %v1500_v49 = vsel %vm1470_vm6, %v1435_v61, %v1370_v26 }
 0x182   :  { %v1532_v34 = vsel %vm1470_vm6, %v1467_v27, %v1402_v25  ;;  %2746 = vmatprep.mubr.msk.bf16.mxu0 %vm1555_vm7, %v1500_v49 }
 0x183   :  { %2778 = vmatprep.mubr.msk.bf16.mxu1 %vm1555_vm7, %v1532_v34 }
 0x184   :  { %v1372_v30 = vpop.permute.xlu0 %1371 }
 0x185   :  { %v1404_v35 = vpop.permute.xlu1 %1403  ;;  %v1502_v46 = vsel %vm1470_vm6, %v1437_v53, %v1372_v30 }
 0x186   :  { %v1534_v39 = vsel %vm1470_vm6, %v1469_v15, %v1404_v35  ;;  %2747 = vmatmul.mubr.msk.bf16.gmra.mrb[28].mxu0 %vm1555_vm7, %v1502_v46 }
 0x187   :  { %2779 = vmatmul.mubr.msk.bf16.gmra.mrb[28].mxu1 %vm1555_vm7, %v1534_v39 }
 0x1e9   :  { %v2720_v32 = vpop.f32.mrb[0].mxu0 }
 0x1ea   :  { %v2752_v11 = vpop.f32.mrb[0].mxu1  ;;  %v1920_v59 = vmul.f32 %v2720_v32, %v4037_v8  ;;  %v1658_v47 = vpop.f32.mrb[1].mxu0 }
 0x1eb   :  { %v1952_v63 = vmul.f32 %v2752_v11, %v4037_v8  ;;  %v1786_v48 = vpop.f32.mrb[1].mxu1  ;;  %v1918_v2 = vmul.f32 %v4037_v8, %v1658_v47  ;;  %v2721_v38 = vpop.f32.mrb[2].mxu0 }
 0x1ec   :  { %v1950_v3 = vmul.f32 %v4037_v8, %v1786_v48  ;;  %v2753_v14 = vpop.f32.mrb[2].mxu1  ;;  %v1989_v57 = vadd.f32 %v4042_v4, %v1920_v59  ;;  %v1921_v45 = vmul.f32 %v2721_v38, %v4037_v8  ;;  %v1661_v40 = vpop.f32.mrb[3].mxu0 }
 0x1ed   :  { %v2021_v36 = vadd.f32 %v4042_v4, %v1952_v63  ;;  %v1953_v19 = vmul.f32 %v2753_v14, %v4037_v8  ;;  %v1789_v23 = vpop.f32.mrb[3].mxu1  ;;  %v1987_v37 = vadd.f32 %v4042_v4, %v1918_v2  ;;  %v1919_v20 = vmul.f32 %v4037_v8, %v1661_v40 }
 0x1ee   :  { %v2019_v0 = vadd.f32 %v4042_v4, %v1950_v3  ;;  %v1951_v33 = vmul.f32 %v4037_v8, %v1789_v23  ;;  %v2053_v9 = vmax.f32 %v1989_v57, 0.0  ;;  %v1990_v54 = vadd.f32 %v4042_v4, %v1921_v45 }
 0x1ef   :  { %v2085_v41 = vmax.f32 %v2021_v36, 0.0  ;;  %v2022_v58 = vadd.f32 %v4042_v4, %v1953_v19  ;;  %v2051_v42 = vmax.f32 %v1987_v37, 0.0  ;;  %v1988_v18 = vadd.f32 %v4042_v4, %v1919_v20 }
 0x1f0   :  { %v2083_v43 = vmax.f32 %v2019_v0, 0.0  ;;  %v2020_v55 = vadd.f32 %v4042_v4, %v1951_v33  ;;  %v2615_v50 = vpack.c.bf16 %v2053_v9, %v2053_v9  ;;  %v2054_v60 = vmax.f32 %v1990_v54, 0.0 }
 0x1f1   :  { %v2647_v62 = vpack.c.bf16 %v2085_v41, %v2085_v41  ;;  %v2086_v29 = vmax.f32 %v2022_v58, 0.0  ;;  %v2613_v5 = vpack.c.bf16 %v2051_v42, %v2051_v42  ;;  %v2052_v51 = vmax.f32 %v1988_v18, 0.0 }
 0x1f2   :  { %v2645_v10 = vpack.c.bf16 %v2083_v43, %v2083_v43  ;;  %v2084_v52 = vmax.f32 %v2020_v55, 0.0  ;;  %2374 = vst.msk [vmem:[%s4431_s3 + $0x8] sm:$0xf] %vm2371_vm8, %v2615_v50  ;;  %v2616_v6 = vpack.c.bf16 %v2054_v60, %v2054_v60 }
 0x1f3   :  { %2406 = vst.msk [vmem:[%s4431_s3 + $0x88] sm:$0xf] %vm2371_vm8, %v2647_v62  ;;  %v2648_v13 = vpack.c.bf16 %v2086_v29, %v2086_v29  ;;  %2372 = vst.msk [vmem:[%s4431_s3] sm:$0xf] %vm2371_vm8, %v2613_v5  ;;  %v2614_v31 = vpack.c.bf16 %v2052_v51, %v2052_v51 }
 0x1f4   :  { %2404 = vst.msk [vmem:[%s4431_s3 + $0x80] sm:$0xf] %vm2371_vm8, %v2645_v10  ;;  %v2646_v7 = vpack.c.bf16 %v2084_v52, %v2084_v52  ;;  %2375 = vst.msk [vmem:[%s4431_s3 + $0xc] sm:$0xf] %vm2371_vm8, %v2616_v6 }
 0x1f5   :  { %2407 = vst.msk [vmem:[%s4431_s3 + $0x8c] sm:$0xf] %vm2371_vm8, %v2648_v13  ;;  %2373 = vst.msk [vmem:[%s4431_s3 + $0x4] sm:$0xf] %vm2371_vm8, %v2614_v31 }
 0x1f6   :  { %2405 = vst.msk [vmem:[%s4431_s3 + $0x84] sm:$0xf] %vm2371_vm8, %v2646_v7 }
 0x1f9   :  { %v2724_v12 = vpop.f32.mrb[4].mxu0 }
 0x1fa   :  { %v2756_v44 = vpop.f32.mrb[4].mxu1  ;;  %v1924_v17 = vmul.f32 %v2724_v12, %v4037_v8  ;;  %v1674_v1 = vpop.f32.mrb[5].mxu0 }
 0x1fb   :  { %v1956_v21 = vmul.f32 %v2756_v44, %v4037_v8  ;;  %v1802_v22 = vpop.f32.mrb[5].mxu1  ;;  %v1922_v56 = vmul.f32 %v4037_v8, %v1674_v1  ;;  %v2725_v16 = vpop.f32.mrb[6].mxu0 }
 0x1fc   :  { %v1954_v28 = vmul.f32 %v4037_v8, %v1802_v22  ;;  %v2757_v24 = vpop.f32.mrb[6].mxu1  ;;  %v1993_v27 = vadd.f32 %v4042_v4, %v1924_v17  ;;  %v1925_v25 = vmul.f32 %v2725_v16, %v4037_v8  ;;  %v1677_v34 = vpop.f32.mrb[7].mxu0 }
 0x1fd   :  { %v2025_v61 = vadd.f32 %v4042_v4, %v1956_v21  ;;  %v1957_v26 = vmul.f32 %v2757_v24, %v4037_v8  ;;  %v1805_v49 = vpop.f32.mrb[7].mxu1  ;;  %v1991_v15 = vadd.f32 %v4042_v4, %v1922_v56  ;;  %v1923_v35 = vmul.f32 %v4037_v8, %v1677_v34 }
 0x1fe   :  { %v2023_v53 = vadd.f32 %v4042_v4, %v1954_v28  ;;  %v1955_v30 = vmul.f32 %v4037_v8, %v1805_v49  ;;  %v2057_v39 = vmax.f32 %v1993_v27, 0.0  ;;  %v1994_v32 = vadd.f32 %v4042_v4, %v1925_v25 }
 0x1ff   :  { %v2089_v46 = vmax.f32 %v2025_v61, 0.0  ;;  %v2026_v11 = vadd.f32 %v4042_v4, %v1957_v26  ;;  %v2055_v59 = vmax.f32 %v1991_v15, 0.0  ;;  %v1992_v47 = vadd.f32 %v4042_v4, %v1923_v35 }
 0x200   :  { %v2087_v63 = vmax.f32 %v2023_v53, 0.0  ;;  %v2024_v48 = vadd.f32 %v4042_v4, %v1955_v30  ;;  %v2619_v2 = vpack.c.bf16 %v2057_v39, %v2057_v39  ;;  %v2058_v38 = vmax.f32 %v1994_v32, 0.0 }
 0x201   :  { %v2651_v3 = vpack.c.bf16 %v2089_v46, %v2089_v46  ;;  %v2090_v14 = vmax.f32 %v2026_v11, 0.0  ;;  %v2617_v57 = vpack.c.bf16 %v2055_v59, %v2055_v59  ;;  %v2056_v45 = vmax.f32 %v1992_v47, 0.0 }
 0x202   :  { %v2649_v36 = vpack.c.bf16 %v2087_v63, %v2087_v63  ;;  %v2088_v19 = vmax.f32 %v2024_v48, 0.0  ;;  %2378 = vst.msk [vmem:[%s4431_s3 + $0x18] sm:$0xf] %vm2371_vm8, %v2619_v2  ;;  %v2620_v40 = vpack.c.bf16 %v2058_v38, %v2058_v38 }
 0x203   :  { %2410 = vst.msk [vmem:[%s4431_s3 + $0x98] sm:$0xf] %vm2371_vm8, %v2651_v3  ;;  %v2652_v23 = vpack.c.bf16 %v2090_v14, %v2090_v14  ;;  %2376 = vst.msk [vmem:[%s4431_s3 + $0x10] sm:$0xf] %vm2371_vm8, %v2617_v57  ;;  %v2618_v37 = vpack.c.bf16 %v2056_v45, %v2056_v45 }
 0x204   :  { %2408 = vst.msk [vmem:[%s4431_s3 + $0x90] sm:$0xf] %vm2371_vm8, %v2649_v36  ;;  %v2650_v0 = vpack.c.bf16 %v2088_v19, %v2088_v19  ;;  %2379 = vst.msk [vmem:[%s4431_s3 + $0x1c] sm:$0xf] %vm2371_vm8, %v2620_v40 }
 0x205   :  { %2411 = vst.msk [vmem:[%s4431_s3 + $0x9c] sm:$0xf] %vm2371_vm8, %v2652_v23  ;;  %2377 = vst.msk [vmem:[%s4431_s3 + $0x14] sm:$0xf] %vm2371_vm8, %v2618_v37 }
 0x206   :  { %2409 = vst.msk [vmem:[%s4431_s3 + $0x94] sm:$0xf] %vm2371_vm8, %v2650_v0 }
 0x209   :  { %v2728_v20 = vpop.f32.mrb[8].mxu0 }
 0x20a   :  { %v2760_v33 = vpop.f32.mrb[8].mxu1  ;;  %v1928_v9 = vmul.f32 %v2728_v20, %v4037_v8  ;;  %v1690_v54 = vpop.f32.mrb[9].mxu0 }
 0x20b   :  { %v1960_v41 = vmul.f32 %v2760_v33, %v4037_v8  ;;  %v1818_v58 = vpop.f32.mrb[9].mxu1  ;;  %v1926_v42 = vmul.f32 %v4037_v8, %v1690_v54  ;;  %v2729_v18 = vpop.f32.mrb[10].mxu0 }
 0x20c   :  { %v1958_v43 = vmul.f32 %v4037_v8, %v1818_v58  ;;  %v2761_v55 = vpop.f32.mrb[10].mxu1  ;;  %v1997_v50 = vadd.f32 %v4042_v4, %v1928_v9  ;;  %v1929_v60 = vmul.f32 %v2729_v18, %v4037_v8  ;;  %v1693_v5 = vpop.f32.mrb[11].mxu0 }
 0x20d   :  { %v2029_v62 = vadd.f32 %v4042_v4, %v1960_v41  ;;  %v1961_v29 = vmul.f32 %v2761_v55, %v4037_v8  ;;  %v1821_v10 = vpop.f32.mrb[11].mxu1  ;;  %v1995_v51 = vadd.f32 %v4042_v4, %v1926_v42  ;;  %v1927_v6 = vmul.f32 %v4037_v8, %v1693_v5 }
 0x20e   :  { %v2027_v52 = vadd.f32 %v4042_v4, %v1958_v43  ;;  %v1959_v13 = vmul.f32 %v4037_v8, %v1821_v10  ;;  %v2061_v31 = vmax.f32 %v1997_v50, 0.0  ;;  %v1998_v12 = vadd.f32 %v4042_v4, %v1929_v60 }
 0x20f   :  { %v2093_v7 = vmax.f32 %v2029_v62, 0.0  ;;  %v2030_v44 = vadd.f32 %v4042_v4, %v1961_v29  ;;  %v2059_v17 = vmax.f32 %v1995_v51, 0.0  ;;  %v1996_v1 = vadd.f32 %v4042_v4, %v1927_v6 }
 0x210   :  { %v2091_v21 = vmax.f32 %v2027_v52, 0.0  ;;  %v2028_v22 = vadd.f32 %v4042_v4, %v1959_v13  ;;  %v2623_v56 = vpack.c.bf16 %v2061_v31, %v2061_v31  ;;  %v2062_v16 = vmax.f32 %v1998_v12, 0.0 }
 0x211   :  { %v2655_v28 = vpack.c.bf16 %v2093_v7, %v2093_v7  ;;  %v2094_v24 = vmax.f32 %v2030_v44, 0.0  ;;  %v2621_v27 = vpack.c.bf16 %v2059_v17, %v2059_v17  ;;  %v2060_v25 = vmax.f32 %v1996_v1, 0.0 }
 0x212   :  { %v2653_v61 = vpack.c.bf16 %v2091_v21, %v2091_v21  ;;  %v2092_v26 = vmax.f32 %v2028_v22, 0.0  ;;  %2382 = vst.msk [vmem:[%s4431_s3 + $0x28] sm:$0xf] %vm2371_vm8, %v2623_v56  ;;  %v2624_v34 = vpack.c.bf16 %v2062_v16, %v2062_v16 }
 0x213   :  { %2414 = vst.msk [vmem:[%s4431_s3 + $0xa8] sm:$0xf] %vm2371_vm8, %v2655_v28  ;;  %v2656_v49 = vpack.c.bf16 %v2094_v24, %v2094_v24  ;;  %2380 = vst.msk [vmem:[%s4431_s3 + $0x20] sm:$0xf] %vm2371_vm8, %v2621_v27  ;;  %v2622_v15 = vpack.c.bf16 %v2060_v25, %v2060_v25 }
 0x214   :  { %2412 = vst.msk [vmem:[%s4431_s3 + $0xa0] sm:$0xf] %vm2371_vm8, %v2653_v61  ;;  %v2654_v53 = vpack.c.bf16 %v2092_v26, %v2092_v26  ;;  %2383 = vst.msk [vmem:[%s4431_s3 + $0x2c] sm:$0xf] %vm2371_vm8, %v2624_v34 }
 0x215   :  { %2415 = vst.msk [vmem:[%s4431_s3 + $0xac] sm:$0xf] %vm2371_vm8, %v2656_v49  ;;  %2381 = vst.msk [vmem:[%s4431_s3 + $0x24] sm:$0xf] %vm2371_vm8, %v2622_v15 }
 0x216   :  { %2413 = vst.msk [vmem:[%s4431_s3 + $0xa4] sm:$0xf] %vm2371_vm8, %v2654_v53 }
 0x219   :  { %v2732_v35 = vpop.f32.mrb[12].mxu0 }
 0x21a   :  { %v2764_v30 = vpop.f32.mrb[12].mxu1  ;;  %v1932_v39 = vmul.f32 %v2732_v35, %v4037_v8  ;;  %v1706_v32 = vpop.f32.mrb[13].mxu0 }
 0x21b   :  { %v1964_v46 = vmul.f32 %v2764_v30, %v4037_v8  ;;  %v1834_v11 = vpop.f32.mrb[13].mxu1  ;;  %v1930_v59 = vmul.f32 %v4037_v8, %v1706_v32  ;;  %v2733_v47 = vpop.f32.mrb[14].mxu0 }
 0x21c   :  { %v1962_v63 = vmul.f32 %v4037_v8, %v1834_v11  ;;  %v2765_v48 = vpop.f32.mrb[14].mxu1  ;;  %v2001_v2 = vadd.f32 %v4042_v4, %v1932_v39  ;;  %v1933_v38 = vmul.f32 %v2733_v47, %v4037_v8  ;;  %v1709_v57 = vpop.f32.mrb[15].mxu0 }
 0x21d   :  { %v2033_v3 = vadd.f32 %v4042_v4, %v1964_v46  ;;  %v1965_v14 = vmul.f32 %v2765_v48, %v4037_v8  ;;  %v1837_v36 = vpop.f32.mrb[15].mxu1  ;;  %v1999_v45 = vadd.f32 %v4042_v4, %v1930_v59  ;;  %v1931_v40 = vmul.f32 %v4037_v8, %v1709_v57 }
 0x21e   :  { %v2031_v19 = vadd.f32 %v4042_v4, %v1962_v63  ;;  %v1963_v23 = vmul.f32 %v4037_v8, %v1837_v36  ;;  %v2065_v37 = vmax.f32 %v2001_v2, 0.0  ;;  %v2002_v20 = vadd.f32 %v4042_v4, %v1933_v38 }
 0x21f   :  { %v2097_v0 = vmax.f32 %v2033_v3, 0.0  ;;  %v2034_v33 = vadd.f32 %v4042_v4, %v1965_v14  ;;  %v2063_v9 = vmax.f32 %v1999_v45, 0.0  ;;  %v2000_v54 = vadd.f32 %v4042_v4, %v1931_v40 }
 0x220   :  { %v2095_v41 = vmax.f32 %v2031_v19, 0.0  ;;  %v2032_v58 = vadd.f32 %v4042_v4, %v1963_v23  ;;  %v2627_v42 = vpack.c.bf16 %v2065_v37, %v2065_v37  ;;  %v2066_v18 = vmax.f32 %v2002_v20, 0.0 }
 0x221   :  { %v2659_v43 = vpack.c.bf16 %v2097_v0, %v2097_v0  ;;  %v2098_v55 = vmax.f32 %v2034_v33, 0.0  ;;  %v2625_v50 = vpack.c.bf16 %v2063_v9, %v2063_v9  ;;  %v2064_v60 = vmax.f32 %v2000_v54, 0.0 }
 0x222   :  { %v2657_v62 = vpack.c.bf16 %v2095_v41, %v2095_v41  ;;  %v2096_v29 = vmax.f32 %v2032_v58, 0.0  ;;  %2386 = vst.msk [vmem:[%s4431_s3 + $0x38] sm:$0xf] %vm2371_vm8, %v2627_v42  ;;  %v2628_v5 = vpack.c.bf16 %v2066_v18, %v2066_v18 }
 0x223   :  { %2418 = vst.msk [vmem:[%s4431_s3 + $0xb8] sm:$0xf] %vm2371_vm8, %v2659_v43  ;;  %v2660_v10 = vpack.c.bf16 %v2098_v55, %v2098_v55  ;;  %2384 = vst.msk [vmem:[%s4431_s3 + $0x30] sm:$0xf] %vm2371_vm8, %v2625_v50  ;;  %v2626_v51 = vpack.c.bf16 %v2064_v60, %v2064_v60 }
 0x224   :  { %2416 = vst.msk [vmem:[%s4431_s3 + $0xb0] sm:$0xf] %vm2371_vm8, %v2657_v62  ;;  %v2658_v52 = vpack.c.bf16 %v2096_v29, %v2096_v29  ;;  %2387 = vst.msk [vmem:[%s4431_s3 + $0x3c] sm:$0xf] %vm2371_vm8, %v2628_v5 }
 0x225   :  { %2419 = vst.msk [vmem:[%s4431_s3 + $0xbc] sm:$0xf] %vm2371_vm8, %v2660_v10  ;;  %2385 = vst.msk [vmem:[%s4431_s3 + $0x34] sm:$0xf] %vm2371_vm8, %v2626_v51 }
 0x226   :  { %2417 = vst.msk [vmem:[%s4431_s3 + $0xb4] sm:$0xf] %vm2371_vm8, %v2658_v52 }
 0x229   :  { %v2736_v6 = vpop.f32.mrb[16].mxu0 }
 0x22a   :  { %v2768_v13 = vpop.f32.mrb[16].mxu1  ;;  %v1936_v31 = vmul.f32 %v2736_v6, %v4037_v8  ;;  %v1722_v12 = vpop.f32.mrb[17].mxu0 }
 0x22b   :  { %v1968_v7 = vmul.f32 %v2768_v13, %v4037_v8  ;;  %v1850_v44 = vpop.f32.mrb[17].mxu1  ;;  %v1934_v17 = vmul.f32 %v4037_v8, %v1722_v12  ;;  %v2737_v1 = vpop.f32.mrb[18].mxu0 }
 0x22c   :  { %v1966_v21 = vmul.f32 %v4037_v8, %v1850_v44  ;;  %v2769_v22 = vpop.f32.mrb[18].mxu1  ;;  %v2005_v56 = vadd.f32 %v4042_v4, %v1936_v31  ;;  %v1937_v16 = vmul.f32 %v2737_v1, %v4037_v8  ;;  %v1725_v27 = vpop.f32.mrb[19].mxu0 }
 0x22d   :  { %v2037_v28 = vadd.f32 %v4042_v4, %v1968_v7  ;;  %v1969_v24 = vmul.f32 %v2769_v22, %v4037_v8  ;;  %v1853_v61 = vpop.f32.mrb[19].mxu1  ;;  %v2003_v25 = vadd.f32 %v4042_v4, %v1934_v17  ;;  %v1935_v34 = vmul.f32 %v4037_v8, %v1725_v27 }
 0x22e   :  { %v2035_v26 = vadd.f32 %v4042_v4, %v1966_v21  ;;  %v1967_v49 = vmul.f32 %v4037_v8, %v1853_v61  ;;  %v2069_v15 = vmax.f32 %v2005_v56, 0.0  ;;  %v2006_v35 = vadd.f32 %v4042_v4, %v1937_v16 }
 0x22f   :  { %v2101_v53 = vmax.f32 %v2037_v28, 0.0  ;;  %v2038_v30 = vadd.f32 %v4042_v4, %v1969_v24  ;;  %v2067_v39 = vmax.f32 %v2003_v25, 0.0  ;;  %v2004_v32 = vadd.f32 %v4042_v4, %v1935_v34 }
 0x230   :  { %v2099_v46 = vmax.f32 %v2035_v26, 0.0  ;;  %v2036_v11 = vadd.f32 %v4042_v4, %v1967_v49  ;;  %v2631_v59 = vpack.c.bf16 %v2069_v15, %v2069_v15  ;;  %v2070_v47 = vmax.f32 %v2006_v35, 0.0 }
 0x231   :  { %v2663_v63 = vpack.c.bf16 %v2101_v53, %v2101_v53  ;;  %v2102_v48 = vmax.f32 %v2038_v30, 0.0  ;;  %v2629_v2 = vpack.c.bf16 %v2067_v39, %v2067_v39  ;;  %v2068_v38 = vmax.f32 %v2004_v32, 0.0 }
 0x232   :  { %v2661_v3 = vpack.c.bf16 %v2099_v46, %v2099_v46  ;;  %v2100_v14 = vmax.f32 %v2036_v11, 0.0  ;;  %2390 = vst.msk [vmem:[%s4431_s3 + $0x48] sm:$0xf] %vm2371_vm8, %v2631_v59  ;;  %v2632_v57 = vpack.c.bf16 %v2070_v47, %v2070_v47 }
 0x233   :  { %2422 = vst.msk [vmem:[%s4431_s3 + $0xc8] sm:$0xf] %vm2371_vm8, %v2663_v63  ;;  %v2664_v36 = vpack.c.bf16 %v2102_v48, %v2102_v48  ;;  %2388 = vst.msk [vmem:[%s4431_s3 + $0x40] sm:$0xf] %vm2371_vm8, %v2629_v2  ;;  %v2630_v45 = vpack.c.bf16 %v2068_v38, %v2068_v38 }
 0x234   :  { %2420 = vst.msk [vmem:[%s4431_s3 + $0xc0] sm:$0xf] %vm2371_vm8, %v2661_v3  ;;  %v2662_v19 = vpack.c.bf16 %v2100_v14, %v2100_v14  ;;  %2391 = vst.msk [vmem:[%s4431_s3 + $0x4c] sm:$0xf] %vm2371_vm8, %v2632_v57 }
 0x235   :  { %2423 = vst.msk [vmem:[%s4431_s3 + $0xcc] sm:$0xf] %vm2371_vm8, %v2664_v36  ;;  %2389 = vst.msk [vmem:[%s4431_s3 + $0x44] sm:$0xf] %vm2371_vm8, %v2630_v45 }
 0x236   :  { %2421 = vst.msk [vmem:[%s4431_s3 + $0xc4] sm:$0xf] %vm2371_vm8, %v2662_v19 }
 0x239   :  { %v2740_v40 = vpop.f32.mrb[20].mxu0 }
 0x23a   :  { %v2772_v23 = vpop.f32.mrb[20].mxu1  ;;  %v1940_v37 = vmul.f32 %v2740_v40, %v4037_v8  ;;  %v1738_v20 = vpop.f32.mrb[21].mxu0 }
 0x23b   :  { %v1972_v0 = vmul.f32 %v2772_v23, %v4037_v8  ;;  %v1866_v33 = vpop.f32.mrb[21].mxu1  ;;  %v1938_v9 = vmul.f32 %v4037_v8, %v1738_v20  ;;  %v2741_v54 = vpop.f32.mrb[22].mxu0 }
 0x23c   :  { %v1970_v41 = vmul.f32 %v4037_v8, %v1866_v33  ;;  %v2773_v58 = vpop.f32.mrb[22].mxu1  ;;  %v2009_v42 = vadd.f32 %v4042_v4, %v1940_v37  ;;  %v1941_v18 = vmul.f32 %v2741_v54, %v4037_v8  ;;  %v1741_v50 = vpop.f32.mrb[23].mxu0 }
 0x23d   :  { %v2041_v43 = vadd.f32 %v4042_v4, %v1972_v0  ;;  %v1973_v55 = vmul.f32 %v2773_v58, %v4037_v8  ;;  %v1869_v62 = vpop.f32.mrb[23].mxu1  ;;  %v2007_v60 = vadd.f32 %v4042_v4, %v1938_v9  ;;  %v1939_v5 = vmul.f32 %v4037_v8, %v1741_v50 }
 0x23e   :  { %v2039_v29 = vadd.f32 %v4042_v4, %v1970_v41  ;;  %v1971_v10 = vmul.f32 %v4037_v8, %v1869_v62  ;;  %v2073_v51 = vmax.f32 %v2009_v42, 0.0  ;;  %v2010_v6 = vadd.f32 %v4042_v4, %v1941_v18 }
 0x23f   :  { %v2105_v52 = vmax.f32 %v2041_v43, 0.0  ;;  %v2042_v13 = vadd.f32 %v4042_v4, %v1973_v55  ;;  %v2071_v31 = vmax.f32 %v2007_v60, 0.0  ;;  %v2008_v12 = vadd.f32 %v4042_v4, %v1939_v5 }
 0x240   :  { %v2103_v7 = vmax.f32 %v2039_v29, 0.0  ;;  %v2040_v44 = vadd.f32 %v4042_v4, %v1971_v10  ;;  %v2635_v17 = vpack.c.bf16 %v2073_v51, %v2073_v51  ;;  %v2074_v1 = vmax.f32 %v2010_v6, 0.0 }
 0x241   :  { %v2667_v21 = vpack.c.bf16 %v2105_v52, %v2105_v52  ;;  %v2106_v22 = vmax.f32 %v2042_v13, 0.0  ;;  %v2633_v56 = vpack.c.bf16 %v2071_v31, %v2071_v31  ;;  %v2072_v16 = vmax.f32 %v2008_v12, 0.0 }
 0x242   :  { %v2665_v28 = vpack.c.bf16 %v2103_v7, %v2103_v7  ;;  %v2104_v24 = vmax.f32 %v2040_v44, 0.0  ;;  %2394 = vst.msk [vmem:[%s4431_s3 + $0x58] sm:$0xf] %vm2371_vm8, %v2635_v17  ;;  %v2636_v27 = vpack.c.bf16 %v2074_v1, %v2074_v1 }
 0x243   :  { %2426 = vst.msk [vmem:[%s4431_s3 + $0xd8] sm:$0xf] %vm2371_vm8, %v2667_v21  ;;  %v2668_v61 = vpack.c.bf16 %v2106_v22, %v2106_v22  ;;  %2392 = vst.msk [vmem:[%s4431_s3 + $0x50] sm:$0xf] %vm2371_vm8, %v2633_v56  ;;  %v2634_v25 = vpack.c.bf16 %v2072_v16, %v2072_v16 }
 0x244   :  { %2424 = vst.msk [vmem:[%s4431_s3 + $0xd0] sm:$0xf] %vm2371_vm8, %v2665_v28  ;;  %v2666_v26 = vpack.c.bf16 %v2104_v24, %v2104_v24  ;;  %2395 = vst.msk [vmem:[%s4431_s3 + $0x5c] sm:$0xf] %vm2371_vm8, %v2636_v27 }
 0x245   :  { %2427 = vst.msk [vmem:[%s4431_s3 + $0xdc] sm:$0xf] %vm2371_vm8, %v2668_v61  ;;  %2393 = vst.msk [vmem:[%s4431_s3 + $0x54] sm:$0xf] %vm2371_vm8, %v2634_v25 }
 0x246   :  { %2425 = vst.msk [vmem:[%s4431_s3 + $0xd4] sm:$0xf] %vm2371_vm8, %v2666_v26 }
 0x249   :  { %v2744_v34 = vpop.f32.mrb[24].mxu0 }
 0x24a   :  { %v2776_v49 = vpop.f32.mrb[24].mxu1  ;;  %v1944_v15 = vmul.f32 %v2744_v34, %v4037_v8  ;;  %v1754_v35 = vpop.f32.mrb[25].mxu0 }
 0x24b   :  { %v1976_v53 = vmul.f32 %v2776_v49, %v4037_v8  ;;  %v1882_v30 = vpop.f32.mrb[25].mxu1  ;;  %v1942_v39 = vmul.f32 %v4037_v8, %v1754_v35  ;;  %v2745_v32 = vpop.f32.mrb[26].mxu0 }
 0x24c   :  { %v1974_v46 = vmul.f32 %v4037_v8, %v1882_v30  ;;  %v2777_v11 = vpop.f32.mrb[26].mxu1  ;;  %v2013_v59 = vadd.f32 %v4042_v4, %v1944_v15  ;;  %v1945_v47 = vmul.f32 %v2745_v32, %v4037_v8  ;;  %v1757_v2 = vpop.f32.mrb[27].mxu0 }
 0x24d   :  { %v2045_v63 = vadd.f32 %v4042_v4, %v1976_v53  ;;  %v1977_v48 = vmul.f32 %v2777_v11, %v4037_v8  ;;  %v1885_v3 = vpop.f32.mrb[27].mxu1  ;;  %v2011_v38 = vadd.f32 %v4042_v4, %v1942_v39  ;;  %v1943_v57 = vmul.f32 %v4037_v8, %v1757_v2 }
 0x24e   :  { %v2043_v14 = vadd.f32 %v4042_v4, %v1974_v46  ;;  %v1975_v36 = vmul.f32 %v4037_v8, %v1885_v3  ;;  %v2077_v45 = vmax.f32 %v2013_v59, 0.0  ;;  %v2014_v40 = vadd.f32 %v4042_v4, %v1945_v47 }
 0x24f   :  { %v2109_v19 = vmax.f32 %v2045_v63, 0.0  ;;  %v2046_v23 = vadd.f32 %v4042_v4, %v1977_v48  ;;  %v2075_v37 = vmax.f32 %v2011_v38, 0.0  ;;  %v2012_v20 = vadd.f32 %v4042_v4, %v1943_v57 }
 0x250   :  { %v2107_v0 = vmax.f32 %v2043_v14, 0.0  ;;  %v2044_v33 = vadd.f32 %v4042_v4, %v1975_v36  ;;  %v2639_v9 = vpack.c.bf16 %v2077_v45, %v2077_v45  ;;  %v2078_v54 = vmax.f32 %v2014_v40, 0.0 }
 0x251   :  { %v2671_v41 = vpack.c.bf16 %v2109_v19, %v2109_v19  ;;  %v2110_v58 = vmax.f32 %v2046_v23, 0.0  ;;  %v2637_v42 = vpack.c.bf16 %v2075_v37, %v2075_v37  ;;  %v2076_v18 = vmax.f32 %v2012_v20, 0.0 }
 0x252   :  { %v2669_v43 = vpack.c.bf16 %v2107_v0, %v2107_v0  ;;  %v2108_v55 = vmax.f32 %v2044_v33, 0.0  ;;  %2398 = vst.msk [vmem:[%s4431_s3 + $0x68] sm:$0xf] %vm2371_vm8, %v2639_v9  ;;  %v2640_v50 = vpack.c.bf16 %v2078_v54, %v2078_v54 }
 0x253   :  { %2430 = vst.msk [vmem:[%s4431_s3 + $0xe8] sm:$0xf] %vm2371_vm8, %v2671_v41  ;;  %v2672_v62 = vpack.c.bf16 %v2110_v58, %v2110_v58  ;;  %2396 = vst.msk [vmem:[%s4431_s3 + $0x60] sm:$0xf] %vm2371_vm8, %v2637_v42  ;;  %v2638_v60 = vpack.c.bf16 %v2076_v18, %v2076_v18 }
 0x254   :  { %2428 = vst.msk [vmem:[%s4431_s3 + $0xe0] sm:$0xf] %vm2371_vm8, %v2669_v43  ;;  %v2670_v29 = vpack.c.bf16 %v2108_v55, %v2108_v55  ;;  %2399 = vst.msk [vmem:[%s4431_s3 + $0x6c] sm:$0xf] %vm2371_vm8, %v2640_v50 }
 0x255   :  { %2431 = vst.msk [vmem:[%s4431_s3 + $0xec] sm:$0xf] %vm2371_vm8, %v2672_v62  ;;  %2397 = vst.msk [vmem:[%s4431_s3 + $0x64] sm:$0xf] %vm2371_vm8, %v2638_v60 }
 0x256   :  { %2429 = vst.msk [vmem:[%s4431_s3 + $0xe4] sm:$0xf] %vm2371_vm8, %v2670_v29 }
 0x259   :  { %v2748_v5 = vpop.f32.mrb[28].mxu0 }
 0x25a   :  { %v2780_v10 = vpop.f32.mrb[28].mxu1  ;;  %v1948_v51 = vmul.f32 %v2748_v5, %v4037_v8  ;;  %v1770_v6 = vpop.f32.mrb[29].mxu0 }
 0x25b   :  { %v1980_v52 = vmul.f32 %v2780_v10, %v4037_v8  ;;  %v1898_v13 = vpop.f32.mrb[29].mxu1  ;;  %v1946_v31 = vmul.f32 %v4037_v8, %v1770_v6  ;;  %v2749_v12 = vpop.f32.mrb[30].mxu0 }
 0x25c   :  { %v1978_v7 = vmul.f32 %v4037_v8, %v1898_v13  ;;  %v2781_v44 = vpop.f32.mrb[30].mxu1  ;;  %v2017_v17 = vadd.f32 %v4042_v4, %v1948_v51  ;;  %v1949_v1 = vmul.f32 %v2749_v12, %v4037_v8  ;;  %v1773_v56 = vpop.f32.mrb[31].mxu0 }
 0x25d   :  { %v2049_v21 = vadd.f32 %v4042_v4, %v1980_v52  ;;  %v1981_v22 = vmul.f32 %v2781_v44, %v4037_v8  ;;  %v1901_v28 = vpop.f32.mrb[31].mxu1  ;;  %v2015_v16 = vadd.f32 %v4042_v4, %v1946_v31  ;;  %v1947_v27 = vmul.f32 %v4037_v8, %v1773_v56 }
 0x25e   :  { %v2047_v24 = vadd.f32 %v4042_v4, %v1978_v7  ;;  %v1979_v61 = vmul.f32 %v4037_v8, %v1901_v28  ;;  %v2081_v25 = vmax.f32 %v2017_v17, 0.0  ;;  %v2018_v34 = vadd.f32 %v4042_v4, %v1949_v1 }
 0x25f   :  { %v2113_v26 = vmax.f32 %v2049_v21, 0.0  ;;  %v2050_v49 = vadd.f32 %v4042_v4, %v1981_v22  ;;  %v2079_v15 = vmax.f32 %v2015_v16, 0.0  ;;  %v2016_v35 = vadd.f32 %v4042_v4, %v1947_v27 }
 0x260   :  { %v2111_v53 = vmax.f32 %v2047_v24, 0.0  ;;  %v2048_v30 = vadd.f32 %v4042_v4, %v1979_v61  ;;  %v2643_v39 = vpack.c.bf16 %v2081_v25, %v2081_v25  ;;  %v2082_v32 = vmax.f32 %v2018_v34, 0.0 }
 0x261   :  { %v2675_v46 = vpack.c.bf16 %v2113_v26, %v2113_v26  ;;  %v2114_v11 = vmax.f32 %v2050_v49, 0.0  ;;  %v2641_v59 = vpack.c.bf16 %v2079_v15, %v2079_v15  ;;  %v2080_v47 = vmax.f32 %v2016_v35, 0.0 }
 0x262   :  { %v2673_v63 = vpack.c.bf16 %v2111_v53, %v2111_v53  ;;  %v2112_v8 = vmax.f32 %v2048_v30, 0.0  ;;  %2402 = vst.msk [vmem:[%s4431_s3 + $0x78] sm:$0xf] %vm2371_vm8, %v2643_v39  ;;  %v2644_v48 = vpack.c.bf16 %v2082_v32, %v2082_v32 }
 0x263   :  { %2434 = vst.msk [vmem:[%s4431_s3 + $0xf8] sm:$0xf] %vm2371_vm8, %v2675_v46  ;;  %v2676_v4 = vpack.c.bf16 %v2114_v11, %v2114_v11  ;;  %2400 = vst.msk [vmem:[%s4431_s3 + $0x70] sm:$0xf] %vm2371_vm8, %v2641_v59  ;;  %v2642_v2 = vpack.c.bf16 %v2080_v47, %v2080_v47 }
 0x264   :  { %2432 = vst.msk [vmem:[%s4431_s3 + $0xf0] sm:$0xf] %vm2371_vm8, %v2673_v63  ;;  %v2674_v3 = vpack.c.bf16 %v2112_v8, %v2112_v8  ;;  %2403 = vst.msk [vmem:[%s4431_s3 + $0x7c] sm:$0xf] %vm2371_vm8, %v2644_v48 }
 0x265   :  { %2435 = vst.msk [vmem:[%s4431_s3 + $0xfc] sm:$0xf] %vm2371_vm8, %v2676_v4  ;;  %2401 = vst.msk [vmem:[%s4431_s3 + $0x74] sm:$0xf] %vm2371_vm8, %v2642_v2 }
 0x266   :  { %2433 = vst.msk [vmem:[%s4431_s3 + $0xf4] sm:$0xf] %vm2371_vm8, %v2674_v3 }

</bundles_post_ra>
